<compile_context>
chip_gen: v7x
topology: tpu7x:2x2x1
jax: 0.10.0
libtpu: 0.0.40
codegen_flags: <defaults>
</compile_context>

<pallas_src>
import functools

import jax
import jax.numpy as jnp
from jax.experimental import pallas as pl
from jax.experimental.pallas import tpu as pltpu

EPS = 1e-5                 # PyTorch BatchNorm1d default eps
LANE = 128                 # TPU lane width: logits are padded to this many columns
MAX_BATCH_BLOCK = 128      # max batch rows per grid step (sublane dim of every matmul)
_HI = jax.lax.Precision.HIGHEST


# ----------------------------------------------------------------------------
# Fused Pallas kernel: whole LeNet1DBN forward for one block of examples
# ----------------------------------------------------------------------------
def _lenet_fused_kernel(x_ref, w1_ref, s1_ref, w2_ref, s2_ref,
                        wf1_ref, bf1_ref, wf2_ref, bf2_ref, wf3_ref, bf3_ref,
                        o_ref):
    """x_ref : (L, BB, Cin) raw input block -- positions leading, batch on sublanes,
               channels on lanes (im2col happens in-kernel via lane-concat).
       w*_ref: (K*Cin, Cout) conv weights with the BN scale pre-folded (im2col layout)
       s*_ref: (1, Cout)     folded BN / conv-bias shift
       wf*/bf*: MLP weights (fc1 rows pre-permuted to the kernel's position-major
                flatten; fc3/bias zero-padded to LANE columns)
       o_ref : (BB, LANE)    lane-dense logits block
    """
    f32, bf16 = jnp.float32, jnp.bfloat16
    L, _, cin = x_ref.shape
    c1 = w1_ref.shape[1]
    c2 = w2_ref.shape[1]
    k1 = w1_ref.shape[0] // cin          # conv1 kernel size
    k2 = w2_ref.shape[0] // c1           # conv2 kernel size
    l1 = L - k1 + 1                      # conv1 output length
    l2 = l1 // 2 - k2 + 1                # conv2 output length (after MaxPool1d(2))

    def mm(a, b):
        # MXU-native bf16 x bf16 -> f32-accumulate matmul.
        return jax.lax.dot_general(a, b, (((1,), (0,)), ((), ())),
                                   preferred_element_type=f32)

    # Hoisted once per grid step: weight casts (every matmul operand in bf16).
    w1 = w1_ref[...].astype(bf16)
    w2 = w2_ref[...].astype(bf16)
    wf1 = wf1_ref[...].astype(bf16)
    wf2 = wf2_ref[...].astype(bf16)
    wf3 = wf3_ref[...].astype(bf16)
    s1 = s1_ref[...]                     # (1, c1) f32, broadcasts over batch rows
    s2 = s2_ref[...]

    def conv_bn_relu_pool(hs, w, shift, k, lout):
        # Conv1d(VALID) + folded BN + ReLU, one output position per MXU matmul:
        # the im2col row is a cheap lane-concat of k shifted per-position slices.
        acts = []
        for t in range(lout):
            xc = jnp.concatenate(hs[t:t + k], axis=1)        # (BB, k*Cin) bf16
            acts.append(jnp.maximum(mm(xc, w) + shift, 0.0)) # f32 ReLU on the VPU
        # MaxPool1d(2): pure elementwise max (no extra MXU work); cast to bf16 for
        # the next matmul (bf16 rounding commutes with max -> matches the reference).
        return [jnp.maximum(acts[2 * p], acts[2 * p + 1]).astype(bf16)
                for p in range(lout // 2)]

    # --- conv tower (batch block rides the sublane dim of every matmul) ---
    xs = [x_ref[t].astype(bf16) for t in range(L)]           # L x (BB, cin)
    h1 = conv_bn_relu_pool(xs, w1, s1, k1, l1)               # p1 x (BB, c1)
    h2 = conv_bn_relu_pool(h1, w2, s2, k2, l2)               # p2 x (BB, c2)

    # --- flatten: single lane-concat, position-major (fc1 rows pre-permuted) ---
    feat = jnp.concatenate(h2, axis=1)                       # (BB, p2*c2) bf16

    # --- fused MLP head: Linear -> ReLU -> Linear -> ReLU -> Linear ---
    h = jnp.maximum(mm(feat, wf1) + bf1_ref[...], 0.0)
    h = jnp.maximum(mm(h.astype(bf16), wf2) + bf2_ref[...], 0.0)
    o_ref[...] = mm(h.astype(bf16), wf3) + bf3_ref[...]      # (BB, LANE) dense store


# ----------------------------------------------------------------------------
# One-time parameter packing (outside the jitted forward)
# ----------------------------------------------------------------------------
def pack_params(p, num_classes):
    """Fold eval-mode BatchNorm into the conv weights, lay conv weights out as
    (K*Cin, Cout) for the in-kernel im2col, pre-transpose the MLP weights (fc1 rows
    permuted to the kernel's position-major flatten), and zero-pad fc3 to LANE output
    columns so the final store is lane-dense."""
    f32 = jnp.float32

    def fold_conv(w, b, g, beta, mu, var):
        scale = (g / jnp.sqrt(var + EPS)).astype(f32)                    # (O,)
        w_kco = jnp.transpose(w.astype(f32), (2, 1, 0)) * scale          # (K, C, O)
        w_flat = w_kco.reshape(-1, w_kco.shape[-1])                      # (K*C, O)
        shift = (beta - mu * scale + b * scale).reshape(1, -1).astype(f32)
        return w_flat, shift

    w1, s1 = fold_conv(p["w1"], p["b1"], p["g1"], p["beta1"], p["mu1"], p["var1"])
    w2, s2 = fold_conv(p["w2"], p["b2"], p["g2"], p["beta2"], p["mu2"], p["var2"])

    c2 = w2.shape[1]
    feat = p["fw1"].shape[1]
    p2 = feat // c2
    # PyTorch view(N, -1) flattens (N, C, L) channel-major (f = c*p2 + t); the kernel
    # builds features position-major (f' = t*c2 + c), so permute fc1's rows once here.
    wf1 = (p["fw1"].T.astype(f32).reshape(c2, p2, -1)
           .transpose(1, 0, 2).reshape(p2 * c2, -1))
    wf2 = p["fw2"].T.astype(f32)
    wf3_t = p["fw3"].T.astype(f32)                                       # (84, num_classes)
    wf3 = jnp.zeros((wf3_t.shape[0], LANE), f32).at[:, :num_classes].set(wf3_t)
    bf3 = jnp.zeros((1, LANE), f32).at[0, :num_classes].set(p["fb3"].astype(f32))

    return {"w1": w1, "s1": s1, "w2": w2, "s2": s2,
            "wf1": wf1, "bf1": p["fb1"].reshape(1, -1).astype(f32),
            "wf2": wf2, "bf2": p["fb2"].reshape(1, -1).astype(f32),
            "wf3": wf3, "bf3": bf3}


# ----------------------------------------------------------------------------
# Jitted forward wrapper (layout plumbing + single pallas_call)
# ----------------------------------------------------------------------------
def _const_block(shape):
    zeros = (0,) * len(shape)
    return pl.BlockSpec(shape, lambda nblk: zeros)


def _round_up(v, m):
    return ((v + m - 1) // m) * m


@functools.partial(jax.jit, static_argnames=("num_classes",))
def lenet1dbn_forward(x_ncl, packed, *, num_classes):
    """x_ncl: (N, C, L) float32 in PyTorch Conv1d layout. Returns (N, num_classes)."""
    n, cin, L = x_ncl.shape
    bb = min(MAX_BATCH_BLOCK, _round_up(n, 8))   # batch rows per grid step
    nb = _round_up(n, bb)

    # Layout plumbing only: NCL -> LNC (positions leading, batch on sublanes,
    # channels on lanes) and pad the batch to the block size.
    x_lnc = jnp.transpose(x_ncl.astype(jnp.float32), (2, 0, 1))
    x_lnc = jnp.pad(x_lnc, ((0, 0), (0, nb - n), (0, 0)))

    weights = (packed["w1"], packed["s1"], packed["w2"], packed["s2"],
               packed["wf1"], packed["bf1"], packed["wf2"], packed["bf2"],
               packed["wf3"], packed["bf3"])

    out = pl.pallas_call(
        _lenet_fused_kernel,
        out_shape=jax.ShapeDtypeStruct((nb, LANE), jnp.float32),
        grid=(nb // bb,),
        in_specs=[pl.BlockSpec((L, bb, cin), lambda nblk: (0, nblk, 0))]
                 + [_const_block(w.shape) for w in weights],
        out_specs=pl.BlockSpec((bb, LANE), lambda nblk: (nblk, 0)),
        compiler_params=pltpu.CompilerParams(dimension_semantics=("parallel",)),
    )(x_lnc, *weights)

    return out[:n, :num_classes]


# ----------------------------------------------------------------------------
# Pure-JAX references (independent formulations)
# ----------------------------------------------------------------------------
def ref_forward(x, p):
    """float32 / HIGHEST-precision reference in PyTorch NCL layout."""
    def conv1d(h, w, b):
        O, C, K = w.shape
        Lout = h.shape[2] - K + 1
        out = jnp.zeros((h.shape[0], O, Lout), jnp.float32) + b[None, :, None]
        for k in range(K):
            out = out + jnp.einsum('ncl,oc->nol', h[:, :, k:k + Lout], w[:, :, k],
                                   precision=_HI)
        return out

    def bn(h, g, beta, mu, var):
        return (h - mu[None, :, None]) * (g[None, :, None]
                / jnp.sqrt(var[None, :, None] + EPS)) + beta[None, :, None]

    def pool(h):
        N, C, L = h.shape
        return h[:, :, :(L // 2) * 2].reshape(N, C, L // 2, 2).max(-1)

    h = pool(jax.nn.relu(bn(conv1d(x, p["w1"], p["b1"]),
                            p["g1"], p["beta1"], p["mu1"], p["var1"])))
    h = pool(jax.nn.relu(bn(conv1d(h, p["w2"], p["b2"]),
                            p["g2"], p["beta2"], p["mu2"], p["var2"])))
    h = h.reshape(h.shape[0], -1)
    h = jax.nn.relu(jnp.dot(h, p["fw1"].T, precision=_HI) + p["fb1"])
    h = jax.nn.relu(jnp.dot(h, p["fw2"].T, precision=_HI) + p["fb2"])
    return jnp.dot(h, p["fw3"].T, precision=_HI) + p["fb3"]


def ref_forward_bf16(x, p):
    """Independent formulation (XLA conv / dot) with the kernel's numerics recipe:
    BN folded in f32, matmul/conv inputs rounded to bf16, f32 accumulation, all
    other elementwise math in f32.  Used for the tight correctness check."""
    bf16, f32 = jnp.bfloat16, jnp.float32

    def conv_bn(h, w, b, g, beta, mu, var):
        scale = g / jnp.sqrt(var + EPS)
        wf = w * scale[:, None, None]
        shift = beta - mu * scale + b * scale
        y = jax.lax.conv_general_dilated(
            h.astype(bf16), wf.astype(bf16), window_strides=(1,), padding="VALID",
            dimension_numbers=("NCH", "OIH", "NCH"),
            preferred_element_type=f32)
        return y + shift[None, :, None]

    def pool(h):
        N, C, L = h.shape
        return h[:, :, :(L // 2) * 2].reshape(N, C, L // 2, 2).max(-1)

    def lin(h, w, b):
        return jnp.dot(h.astype(bf16), w.T.astype(bf16),
                       preferred_element_type=f32) + b

    h = pool(jax.nn.relu(conv_bn(x, p["w1"], p["b1"], p["g1"],
                                 p["beta1"], p["mu1"], p["var1"])))
    h = pool(jax.nn.relu(conv_bn(h, p["w2"], p["b2"], p["g2"],
                                 p["beta2"], p["mu2"], p["var2"])))
    h = h.reshape(h.shape[0], -1)
    h = jax.nn.relu(lin(h, p["fw1"], p["fb1"]))
    h = jax.nn.relu(lin(h, p["fw2"], p["fb2"]))
    return lin(h, p["fw3"], p["fb3"])


# ----------------------------------------------------------------------------
# Deterministic synthetic parameters (shapes as in LeNet1DBN.__init__)
# ----------------------------------------------------------------------------
def init_params(key, in_channels, num_classes, conv_out_len):
    ks = jax.random.split(key, 18)
    f = lambda k, shape, s=0.1: (s * jax.random.normal(k, shape)).astype(jnp.float32)
    return {
        "w1": f(ks[0], (6, in_channels, 5)),            # Conv1d(in, 6, 5)
        "b1": f(ks[1], (6,)),
        "g1": 1.0 + f(ks[2], (6,)),                     # BatchNorm1d(6)
        "beta1": f(ks[3], (6,)),
        "mu1": f(ks[4], (6,)),
        "var1": jax.random.uniform(ks[5], (6,), jnp.float32, 0.5, 1.5),
        "w2": f(ks[6], (16, 6, 5)),                     # Conv1d(6, 16, 5)
        "b2": f(ks[7], (16,)),
        "g2": 1.0 + f(ks[8], (16,)),                    # BatchNorm1d(16)
        "beta2": f(ks[9], (16,)),
        "mu2": f(ks[10], (16,)),
        "var2": jax.random.uniform(ks[11], (16,), jnp.float32, 0.5, 1.5),
        "fw1": f(ks[12], (120, 16 * conv_out_len)),     # Linear(16*conv_out, 120)
        "fb1": f(ks[13], (120,)),
        "fw2": f(ks[14], (84, 120)),                    # Linear(120, 84)
        "fb2": f(ks[15], (84,)),
        "fw3": f(ks[16], (num_classes, 84)),            # Linear(84, num_classes)
        "fb3": f(ks[17], (num_classes,)),
    }


if __name__ == "__main__":
    N, C_IN, L, NUM_CLASSES = 2, 4, 32, 2
    conv_out_len = ((L - 4) // 2 - 4) // 2              # matches _get_conv_output_size

    key = jax.random.PRNGKey(0)
    k_params, k_x = jax.random.split(key)
    params = init_params(k_params, C_IN, NUM_CLASSES, conv_out_len)
    x = jax.random.normal(k_x, (N, C_IN, L), jnp.float32)   # PyTorch NCL input

    packed = pack_params(params, NUM_CLASSES)           # once, outside the jitted forward

    out = lenet1dbn_forward(x, packed, num_classes=NUM_CLASSES)
    out = jax.block_until_ready(out)
    assert out.shape == (N, NUM_CLASSES)

    # Tight check: same bf16-matmul / f32-accumulate numerics, independent formulation.
    ref_tight = ref_forward_bf16(x, params)
    assert jnp.allclose(out, ref_tight, atol=2e-4, rtol=2e-4), (out, ref_tight)

    # Sanity check against the full-f32 reference (bf16 quantization noise only).
    ref_f32 = ref_forward(x, params)
    assert jnp.allclose(out, ref_f32, atol=2e-2, rtol=2e-2), (out, ref_f32)

    print("KERNEL_OK")
</pallas_src>

<mosaic_0001>
module attributes {stable_mosaic.version = 11 : i64} {
  func.func @_lenet_fused_kernel(%arg0: i32, %arg1: memref<32x8x4xf32, #tpu.memory_space<vmem>>, %arg2: memref<20x6xf32, #tpu.memory_space<vmem>>, %arg3: memref<1x6xf32, #tpu.memory_space<vmem>>, %arg4: memref<30x16xf32, #tpu.memory_space<vmem>>, %arg5: memref<1x16xf32, #tpu.memory_space<vmem>>, %arg6: memref<80x120xf32, #tpu.memory_space<vmem>>, %arg7: memref<1x120xf32, #tpu.memory_space<vmem>>, %arg8: memref<120x84xf32, #tpu.memory_space<vmem>>, %arg9: memref<1x84xf32, #tpu.memory_space<vmem>>, %arg10: memref<84x128xf32, #tpu.memory_space<vmem>>, %arg11: memref<1x128xf32, #tpu.memory_space<vmem>>, %arg12: memref<8x128xf32, #tpu.memory_space<vmem>>) attributes {dimension_semantics = [#tpu.dimension_semantics<parallel>], iteration_bounds = array<i64: 1>, scalar_prefetch = 0 : i64, scratch_operands = 0 : i64, tpu.core_type = #tpu.core_type<tc>, window_params = [{transform_indices = @transform_0, window_bounds = array<i64: 32, 8, 4>}, {pipeline_mode = #tpu.pipeline_mode<synchronous>, transform_indices = @transform_1, window_bounds = array<i64: 20, 6>}, {pipeline_mode = #tpu.pipeline_mode<synchronous>, transform_indices = @transform_2, window_bounds = array<i64: 1, 6>}, {pipeline_mode = #tpu.pipeline_mode<synchronous>, transform_indices = @transform_3, window_bounds = array<i64: 30, 16>}, {pipeline_mode = #tpu.pipeline_mode<synchronous>, transform_indices = @transform_4, window_bounds = array<i64: 1, 16>}, {pipeline_mode = #tpu.pipeline_mode<synchronous>, transform_indices = @transform_5, window_bounds = array<i64: 80, 120>}, {pipeline_mode = #tpu.pipeline_mode<synchronous>, transform_indices = @transform_6, window_bounds = array<i64: 1, 120>}, {pipeline_mode = #tpu.pipeline_mode<synchronous>, transform_indices = @transform_7, window_bounds = array<i64: 120, 84>}, {pipeline_mode = #tpu.pipeline_mode<synchronous>, transform_indices = @transform_8, window_bounds = array<i64: 1, 84>}, {pipeline_mode = #tpu.pipeline_mode<synchronous>, transform_indices = @transform_9, window_bounds = array<i64: 84, 128>}, {pipeline_mode = #tpu.pipeline_mode<synchronous>, transform_indices = @transform_10, window_bounds = array<i64: 1, 128>}, {transform_indices = @transform_11, window_bounds = array<i64: 8, 128>}]} {
    %c0 = arith.constant 0 : index
    %c0_0 = arith.constant 0 : index
    %0 = vector.load %arg2[%c0, %c0_0] : memref<20x6xf32, #tpu.memory_space<vmem>>, vector<20x6xf32>
    %1 = arith.truncf %0 : vector<20x6xf32> to vector<20x6xbf16>
    %c0_1 = arith.constant 0 : index
    %c0_2 = arith.constant 0 : index
    %2 = vector.load %arg4[%c0_1, %c0_2] : memref<30x16xf32, #tpu.memory_space<vmem>>, vector<30x16xf32>
    %3 = arith.truncf %2 : vector<30x16xf32> to vector<30x16xbf16>
    %c0_3 = arith.constant 0 : index
    %c0_4 = arith.constant 0 : index
    %4 = vector.load %arg6[%c0_3, %c0_4] : memref<80x120xf32, #tpu.memory_space<vmem>>, vector<80x120xf32>
    %5 = arith.truncf %4 : vector<80x120xf32> to vector<80x120xbf16>
    %c0_5 = arith.constant 0 : index
    %c0_6 = arith.constant 0 : index
    %6 = vector.load %arg8[%c0_5, %c0_6] : memref<120x84xf32, #tpu.memory_space<vmem>>, vector<120x84xf32>
    %7 = arith.truncf %6 : vector<120x84xf32> to vector<120x84xbf16>
    %c0_7 = arith.constant 0 : index
    %c0_8 = arith.constant 0 : index
    %8 = vector.load %arg10[%c0_7, %c0_8] : memref<84x128xf32, #tpu.memory_space<vmem>>, vector<84x128xf32>
    %9 = arith.truncf %8 : vector<84x128xf32> to vector<84x128xbf16>
    %c0_9 = arith.constant 0 : index
    %c0_10 = arith.constant 0 : index
    %10 = vector.load %arg3[%c0_9, %c0_10] : memref<1x6xf32, #tpu.memory_space<vmem>>, vector<1x6xf32>
    %c0_11 = arith.constant 0 : index
    %c0_12 = arith.constant 0 : index
    %11 = vector.load %arg5[%c0_11, %c0_12] : memref<1x16xf32, #tpu.memory_space<vmem>>, vector<1x16xf32>
    %c0_13 = arith.constant 0 : index
    %c0_14 = arith.constant 0 : index
    %c0_15 = arith.constant 0 : index
    %12 = vector.load %arg1[%c0_13, %c0_14, %c0_15] : memref<32x8x4xf32, #tpu.memory_space<vmem>>, vector<1x8x4xf32>
    %13 = vector.shape_cast %12 : vector<1x8x4xf32> to vector<8x4xf32>
    %14 = arith.truncf %13 : vector<8x4xf32> to vector<8x4xbf16>
    %c1 = arith.constant 1 : index
    %c0_16 = arith.constant 0 : index
    %c0_17 = arith.constant 0 : index
    %15 = vector.load %arg1[%c1, %c0_16, %c0_17] : memref<32x8x4xf32, #tpu.memory_space<vmem>>, vector<1x8x4xf32>
    %16 = vector.shape_cast %15 : vector<1x8x4xf32> to vector<8x4xf32>
    %17 = arith.truncf %16 : vector<8x4xf32> to vector<8x4xbf16>
    %c2 = arith.constant 2 : index
    %c0_18 = arith.constant 0 : index
    %c0_19 = arith.constant 0 : index
    %18 = vector.load %arg1[%c2, %c0_18, %c0_19] : memref<32x8x4xf32, #tpu.memory_space<vmem>>, vector<1x8x4xf32>
    %19 = vector.shape_cast %18 : vector<1x8x4xf32> to vector<8x4xf32>
    %20 = arith.truncf %19 : vector<8x4xf32> to vector<8x4xbf16>
    %c3 = arith.constant 3 : index
    %c0_20 = arith.constant 0 : index
    %c0_21 = arith.constant 0 : index
    %21 = vector.load %arg1[%c3, %c0_20, %c0_21] : memref<32x8x4xf32, #tpu.memory_space<vmem>>, vector<1x8x4xf32>
    %22 = vector.shape_cast %21 : vector<1x8x4xf32> to vector<8x4xf32>
    %23 = arith.truncf %22 : vector<8x4xf32> to vector<8x4xbf16>
    %c4 = arith.constant 4 : index
    %c0_22 = arith.constant 0 : index
    %c0_23 = arith.constant 0 : index
    %24 = vector.load %arg1[%c4, %c0_22, %c0_23] : memref<32x8x4xf32, #tpu.memory_space<vmem>>, vector<1x8x4xf32>
    %25 = vector.shape_cast %24 : vector<1x8x4xf32> to vector<8x4xf32>
    %26 = arith.truncf %25 : vector<8x4xf32> to vector<8x4xbf16>
    %c5 = arith.constant 5 : index
    %c0_24 = arith.constant 0 : index
    %c0_25 = arith.constant 0 : index
    %27 = vector.load %arg1[%c5, %c0_24, %c0_25] : memref<32x8x4xf32, #tpu.memory_space<vmem>>, vector<1x8x4xf32>
    %28 = vector.shape_cast %27 : vector<1x8x4xf32> to vector<8x4xf32>
    %29 = arith.truncf %28 : vector<8x4xf32> to vector<8x4xbf16>
    %c6 = arith.constant 6 : index
    %c0_26 = arith.constant 0 : index
    %c0_27 = arith.constant 0 : index
    %30 = vector.load %arg1[%c6, %c0_26, %c0_27] : memref<32x8x4xf32, #tpu.memory_space<vmem>>, vector<1x8x4xf32>
    %31 = vector.shape_cast %30 : vector<1x8x4xf32> to vector<8x4xf32>
    %32 = arith.truncf %31 : vector<8x4xf32> to vector<8x4xbf16>
    %c7 = arith.constant 7 : index
    %c0_28 = arith.constant 0 : index
    %c0_29 = arith.constant 0 : index
    %33 = vector.load %arg1[%c7, %c0_28, %c0_29] : memref<32x8x4xf32, #tpu.memory_space<vmem>>, vector<1x8x4xf32>
    %34 = vector.shape_cast %33 : vector<1x8x4xf32> to vector<8x4xf32>
    %35 = arith.truncf %34 : vector<8x4xf32> to vector<8x4xbf16>
    %c8 = arith.constant 8 : index
    %c0_30 = arith.constant 0 : index
    %c0_31 = arith.constant 0 : index
    %36 = vector.load %arg1[%c8, %c0_30, %c0_31] : memref<32x8x4xf32, #tpu.memory_space<vmem>>, vector<1x8x4xf32>
    %37 = vector.shape_cast %36 : vector<1x8x4xf32> to vector<8x4xf32>
    %38 = arith.truncf %37 : vector<8x4xf32> to vector<8x4xbf16>
    %c9 = arith.constant 9 : index
    %c0_32 = arith.constant 0 : index
    %c0_33 = arith.constant 0 : index
    %39 = vector.load %arg1[%c9, %c0_32, %c0_33] : memref<32x8x4xf32, #tpu.memory_space<vmem>>, vector<1x8x4xf32>
    %40 = vector.shape_cast %39 : vector<1x8x4xf32> to vector<8x4xf32>
    %41 = arith.truncf %40 : vector<8x4xf32> to vector<8x4xbf16>
    %c10 = arith.constant 10 : index
    %c0_34 = arith.constant 0 : index
    %c0_35 = arith.constant 0 : index
    %42 = vector.load %arg1[%c10, %c0_34, %c0_35] : memref<32x8x4xf32, #tpu.memory_space<vmem>>, vector<1x8x4xf32>
    %43 = vector.shape_cast %42 : vector<1x8x4xf32> to vector<8x4xf32>
    %44 = arith.truncf %43 : vector<8x4xf32> to vector<8x4xbf16>
    %c11 = arith.constant 11 : index
    %c0_36 = arith.constant 0 : index
    %c0_37 = arith.constant 0 : index
    %45 = vector.load %arg1[%c11, %c0_36, %c0_37] : memref<32x8x4xf32, #tpu.memory_space<vmem>>, vector<1x8x4xf32>
    %46 = vector.shape_cast %45 : vector<1x8x4xf32> to vector<8x4xf32>
    %47 = arith.truncf %46 : vector<8x4xf32> to vector<8x4xbf16>
    %c12 = arith.constant 12 : index
    %c0_38 = arith.constant 0 : index
    %c0_39 = arith.constant 0 : index
    %48 = vector.load %arg1[%c12, %c0_38, %c0_39] : memref<32x8x4xf32, #tpu.memory_space<vmem>>, vector<1x8x4xf32>
    %49 = vector.shape_cast %48 : vector<1x8x4xf32> to vector<8x4xf32>
    %50 = arith.truncf %49 : vector<8x4xf32> to vector<8x4xbf16>
    %c13 = arith.constant 13 : index
    %c0_40 = arith.constant 0 : index
    %c0_41 = arith.constant 0 : index
    %51 = vector.load %arg1[%c13, %c0_40, %c0_41] : memref<32x8x4xf32, #tpu.memory_space<vmem>>, vector<1x8x4xf32>
    %52 = vector.shape_cast %51 : vector<1x8x4xf32> to vector<8x4xf32>
    %53 = arith.truncf %52 : vector<8x4xf32> to vector<8x4xbf16>
    %c14 = arith.constant 14 : index
    %c0_42 = arith.constant 0 : index
    %c0_43 = arith.constant 0 : index
    %54 = vector.load %arg1[%c14, %c0_42, %c0_43] : memref<32x8x4xf32, #tpu.memory_space<vmem>>, vector<1x8x4xf32>
    %55 = vector.shape_cast %54 : vector<1x8x4xf32> to vector<8x4xf32>
    %56 = arith.truncf %55 : vector<8x4xf32> to vector<8x4xbf16>
    %c15 = arith.constant 15 : index
    %c0_44 = arith.constant 0 : index
    %c0_45 = arith.constant 0 : index
    %57 = vector.load %arg1[%c15, %c0_44, %c0_45] : memref<32x8x4xf32, #tpu.memory_space<vmem>>, vector<1x8x4xf32>
    %58 = vector.shape_cast %57 : vector<1x8x4xf32> to vector<8x4xf32>
    %59 = arith.truncf %58 : vector<8x4xf32> to vector<8x4xbf16>
    %c16 = arith.constant 16 : index
    %c0_46 = arith.constant 0 : index
    %c0_47 = arith.constant 0 : index
    %60 = vector.load %arg1[%c16, %c0_46, %c0_47] : memref<32x8x4xf32, #tpu.memory_space<vmem>>, vector<1x8x4xf32>
    %61 = vector.shape_cast %60 : vector<1x8x4xf32> to vector<8x4xf32>
    %62 = arith.truncf %61 : vector<8x4xf32> to vector<8x4xbf16>
    %c17 = arith.constant 17 : index
    %c0_48 = arith.constant 0 : index
    %c0_49 = arith.constant 0 : index
    %63 = vector.load %arg1[%c17, %c0_48, %c0_49] : memref<32x8x4xf32, #tpu.memory_space<vmem>>, vector<1x8x4xf32>
    %64 = vector.shape_cast %63 : vector<1x8x4xf32> to vector<8x4xf32>
    %65 = arith.truncf %64 : vector<8x4xf32> to vector<8x4xbf16>
    %c18 = arith.constant 18 : index
    %c0_50 = arith.constant 0 : index
    %c0_51 = arith.constant 0 : index
    %66 = vector.load %arg1[%c18, %c0_50, %c0_51] : memref<32x8x4xf32, #tpu.memory_space<vmem>>, vector<1x8x4xf32>
    %67 = vector.shape_cast %66 : vector<1x8x4xf32> to vector<8x4xf32>
    %68 = arith.truncf %67 : vector<8x4xf32> to vector<8x4xbf16>
    %c19 = arith.constant 19 : index
    %c0_52 = arith.constant 0 : index
    %c0_53 = arith.constant 0 : index
    %69 = vector.load %arg1[%c19, %c0_52, %c0_53] : memref<32x8x4xf32, #tpu.memory_space<vmem>>, vector<1x8x4xf32>
    %70 = vector.shape_cast %69 : vector<1x8x4xf32> to vector<8x4xf32>
    %71 = arith.truncf %70 : vector<8x4xf32> to vector<8x4xbf16>
    %c20 = arith.constant 20 : index
    %c0_54 = arith.constant 0 : index
    %c0_55 = arith.constant 0 : index
    %72 = vector.load %arg1[%c20, %c0_54, %c0_55] : memref<32x8x4xf32, #tpu.memory_space<vmem>>, vector<1x8x4xf32>
    %73 = vector.shape_cast %72 : vector<1x8x4xf32> to vector<8x4xf32>
    %74 = arith.truncf %73 : vector<8x4xf32> to vector<8x4xbf16>
    %c21 = arith.constant 21 : index
    %c0_56 = arith.constant 0 : index
    %c0_57 = arith.constant 0 : index
    %75 = vector.load %arg1[%c21, %c0_56, %c0_57] : memref<32x8x4xf32, #tpu.memory_space<vmem>>, vector<1x8x4xf32>
    %76 = vector.shape_cast %75 : vector<1x8x4xf32> to vector<8x4xf32>
    %77 = arith.truncf %76 : vector<8x4xf32> to vector<8x4xbf16>
    %c22 = arith.constant 22 : index
    %c0_58 = arith.constant 0 : index
    %c0_59 = arith.constant 0 : index
    %78 = vector.load %arg1[%c22, %c0_58, %c0_59] : memref<32x8x4xf32, #tpu.memory_space<vmem>>, vector<1x8x4xf32>
    %79 = vector.shape_cast %78 : vector<1x8x4xf32> to vector<8x4xf32>
    %80 = arith.truncf %79 : vector<8x4xf32> to vector<8x4xbf16>
    %c23 = arith.constant 23 : index
    %c0_60 = arith.constant 0 : index
    %c0_61 = arith.constant 0 : index
    %81 = vector.load %arg1[%c23, %c0_60, %c0_61] : memref<32x8x4xf32, #tpu.memory_space<vmem>>, vector<1x8x4xf32>
    %82 = vector.shape_cast %81 : vector<1x8x4xf32> to vector<8x4xf32>
    %83 = arith.truncf %82 : vector<8x4xf32> to vector<8x4xbf16>
    %c24 = arith.constant 24 : index
    %c0_62 = arith.constant 0 : index
    %c0_63 = arith.constant 0 : index
    %84 = vector.load %arg1[%c24, %c0_62, %c0_63] : memref<32x8x4xf32, #tpu.memory_space<vmem>>, vector<1x8x4xf32>
    %85 = vector.shape_cast %84 : vector<1x8x4xf32> to vector<8x4xf32>
    %86 = arith.truncf %85 : vector<8x4xf32> to vector<8x4xbf16>
    %c25 = arith.constant 25 : index
    %c0_64 = arith.constant 0 : index
    %c0_65 = arith.constant 0 : index
    %87 = vector.load %arg1[%c25, %c0_64, %c0_65] : memref<32x8x4xf32, #tpu.memory_space<vmem>>, vector<1x8x4xf32>
    %88 = vector.shape_cast %87 : vector<1x8x4xf32> to vector<8x4xf32>
    %89 = arith.truncf %88 : vector<8x4xf32> to vector<8x4xbf16>
    %c26 = arith.constant 26 : index
    %c0_66 = arith.constant 0 : index
    %c0_67 = arith.constant 0 : index
    %90 = vector.load %arg1[%c26, %c0_66, %c0_67] : memref<32x8x4xf32, #tpu.memory_space<vmem>>, vector<1x8x4xf32>
    %91 = vector.shape_cast %90 : vector<1x8x4xf32> to vector<8x4xf32>
    %92 = arith.truncf %91 : vector<8x4xf32> to vector<8x4xbf16>
    %c27 = arith.constant 27 : index
    %c0_68 = arith.constant 0 : index
    %c0_69 = arith.constant 0 : index
    %93 = vector.load %arg1[%c27, %c0_68, %c0_69] : memref<32x8x4xf32, #tpu.memory_space<vmem>>, vector<1x8x4xf32>
    %94 = vector.shape_cast %93 : vector<1x8x4xf32> to vector<8x4xf32>
    %95 = arith.truncf %94 : vector<8x4xf32> to vector<8x4xbf16>
    %c28 = arith.constant 28 : index
    %c0_70 = arith.constant 0 : index
    %c0_71 = arith.constant 0 : index
    %96 = vector.load %arg1[%c28, %c0_70, %c0_71] : memref<32x8x4xf32, #tpu.memory_space<vmem>>, vector<1x8x4xf32>
    %97 = vector.shape_cast %96 : vector<1x8x4xf32> to vector<8x4xf32>
    %98 = arith.truncf %97 : vector<8x4xf32> to vector<8x4xbf16>
    %c29 = arith.constant 29 : index
    %c0_72 = arith.constant 0 : index
    %c0_73 = arith.constant 0 : index
    %99 = vector.load %arg1[%c29, %c0_72, %c0_73] : memref<32x8x4xf32, #tpu.memory_space<vmem>>, vector<1x8x4xf32>
    %100 = vector.shape_cast %99 : vector<1x8x4xf32> to vector<8x4xf32>
    %101 = arith.truncf %100 : vector<8x4xf32> to vector<8x4xbf16>
    %c30 = arith.constant 30 : index
    %c0_74 = arith.constant 0 : index
    %c0_75 = arith.constant 0 : index
    %102 = vector.load %arg1[%c30, %c0_74, %c0_75] : memref<32x8x4xf32, #tpu.memory_space<vmem>>, vector<1x8x4xf32>
    %103 = vector.shape_cast %102 : vector<1x8x4xf32> to vector<8x4xf32>
    %104 = arith.truncf %103 : vector<8x4xf32> to vector<8x4xbf16>
    %c31 = arith.constant 31 : index
    %c0_76 = arith.constant 0 : index
    %c0_77 = arith.constant 0 : index
    %105 = vector.load %arg1[%c31, %c0_76, %c0_77] : memref<32x8x4xf32, #tpu.memory_space<vmem>>, vector<1x8x4xf32>
    %106 = vector.shape_cast %105 : vector<1x8x4xf32> to vector<8x4xf32>
    %107 = arith.truncf %106 : vector<8x4xf32> to vector<8x4xbf16>
    %108 = tpu.concatenate %14, %17, %20, %23, %26 in 1 : vector<8x4xbf16>, vector<8x4xbf16>, vector<8x4xbf16>, vector<8x4xbf16>, vector<8x4xbf16> -> vector<8x20xbf16>
    %cst = arith.constant dense<0.000000e+00> : vector<8x6xf32>
    %109 = tpu.matmul %108, %1, %cst {dimension_numbers = #tpu.dot_dimension_numbers<[1], [0], [0], [1], [0, 0, 1, 1], [], []>} : vector<8x20xbf16>, vector<20x6xbf16>, vector<8x6xf32> -> vector<8x6xf32>
    %110 = vector.broadcast %10 : vector<1x6xf32> to vector<8x6xf32>
    %111 = arith.addf %109, %110 : vector<8x6xf32>
    %cst_78 = arith.constant 0.000000e+00 : f32
    %112 = vector.broadcast %cst_78 : f32 to vector<8x6xf32>
    %113 = arith.maximumf %111, %112 : vector<8x6xf32>
    %114 = tpu.concatenate %17, %20, %23, %26, %29 in 1 : vector<8x4xbf16>, vector<8x4xbf16>, vector<8x4xbf16>, vector<8x4xbf16>, vector<8x4xbf16> -> vector<8x20xbf16>
    %cst_79 = arith.constant dense<0.000000e+00> : vector<8x6xf32>
    %115 = tpu.matmul %114, %1, %cst_79 {dimension_numbers = #tpu.dot_dimension_numbers<[1], [0], [0], [1], [0, 0, 1, 1], [], []>} : vector<8x20xbf16>, vector<20x6xbf16>, vector<8x6xf32> -> vector<8x6xf32>
    %116 = vector.broadcast %10 : vector<1x6xf32> to vector<8x6xf32>
    %117 = arith.addf %115, %116 : vector<8x6xf32>
    %cst_80 = arith.constant 0.000000e+00 : f32
    %118 = vector.broadcast %cst_80 : f32 to vector<8x6xf32>
    %119 = arith.maximumf %117, %118 : vector<8x6xf32>
    %120 = tpu.concatenate %20, %23, %26, %29, %32 in 1 : vector<8x4xbf16>, vector<8x4xbf16>, vector<8x4xbf16>, vector<8x4xbf16>, vector<8x4xbf16> -> vector<8x20xbf16>
    %cst_81 = arith.constant dense<0.000000e+00> : vector<8x6xf32>
    %121 = tpu.matmul %120, %1, %cst_81 {dimension_numbers = #tpu.dot_dimension_numbers<[1], [0], [0], [1], [0, 0, 1, 1], [], []>} : vector<8x20xbf16>, vector<20x6xbf16>, vector<8x6xf32> -> vector<8x6xf32>
    %122 = vector.broadcast %10 : vector<1x6xf32> to vector<8x6xf32>
    %123 = arith.addf %121, %122 : vector<8x6xf32>
    %cst_82 = arith.constant 0.000000e+00 : f32
    %124 = vector.broadcast %cst_82 : f32 to vector<8x6xf32>
    %125 = arith.maximumf %123, %124 : vector<8x6xf32>
    %126 = tpu.concatenate %23, %26, %29, %32, %35 in 1 : vector<8x4xbf16>, vector<8x4xbf16>, vector<8x4xbf16>, vector<8x4xbf16>, vector<8x4xbf16> -> vector<8x20xbf16>
    %cst_83 = arith.constant dense<0.000000e+00> : vector<8x6xf32>
    %127 = tpu.matmul %126, %1, %cst_83 {dimension_numbers = #tpu.dot_dimension_numbers<[1], [0], [0], [1], [0, 0, 1, 1], [], []>} : vector<8x20xbf16>, vector<20x6xbf16>, vector<8x6xf32> -> vector<8x6xf32>
    %128 = vector.broadcast %10 : vector<1x6xf32> to vector<8x6xf32>
    %129 = arith.addf %127, %128 : vector<8x6xf32>
    %cst_84 = arith.constant 0.000000e+00 : f32
    %130 = vector.broadcast %cst_84 : f32 to vector<8x6xf32>
    %131 = arith.maximumf %129, %130 : vector<8x6xf32>
    %132 = tpu.concatenate %26, %29, %32, %35, %38 in 1 : vector<8x4xbf16>, vector<8x4xbf16>, vector<8x4xbf16>, vector<8x4xbf16>, vector<8x4xbf16> -> vector<8x20xbf16>
    %cst_85 = arith.constant dense<0.000000e+00> : vector<8x6xf32>
    %133 = tpu.matmul %132, %1, %cst_85 {dimension_numbers = #tpu.dot_dimension_numbers<[1], [0], [0], [1], [0, 0, 1, 1], [], []>} : vector<8x20xbf16>, vector<20x6xbf16>, vector<8x6xf32> -> vector<8x6xf32>
    %134 = vector.broadcast %10 : vector<1x6xf32> to vector<8x6xf32>
    %135 = arith.addf %133, %134 : vector<8x6xf32>
    %cst_86 = arith.constant 0.000000e+00 : f32
    %136 = vector.broadcast %cst_86 : f32 to vector<8x6xf32>
    %137 = arith.maximumf %135, %136 : vector<8x6xf32>
    %138 = tpu.concatenate %29, %32, %35, %38, %41 in 1 : vector<8x4xbf16>, vector<8x4xbf16>, vector<8x4xbf16>, vector<8x4xbf16>, vector<8x4xbf16> -> vector<8x20xbf16>
    %cst_87 = arith.constant dense<0.000000e+00> : vector<8x6xf32>
    %139 = tpu.matmul %138, %1, %cst_87 {dimension_numbers = #tpu.dot_dimension_numbers<[1], [0], [0], [1], [0, 0, 1, 1], [], []>} : vector<8x20xbf16>, vector<20x6xbf16>, vector<8x6xf32> -> vector<8x6xf32>
    %140 = vector.broadcast %10 : vector<1x6xf32> to vector<8x6xf32>
    %141 = arith.addf %139, %140 : vector<8x6xf32>
    %cst_88 = arith.constant 0.000000e+00 : f32
    %142 = vector.broadcast %cst_88 : f32 to vector<8x6xf32>
    %143 = arith.maximumf %141, %142 : vector<8x6xf32>
    %144 = tpu.concatenate %32, %35, %38, %41, %44 in 1 : vector<8x4xbf16>, vector<8x4xbf16>, vector<8x4xbf16>, vector<8x4xbf16>, vector<8x4xbf16> -> vector<8x20xbf16>
    %cst_89 = arith.constant dense<0.000000e+00> : vector<8x6xf32>
    %145 = tpu.matmul %144, %1, %cst_89 {dimension_numbers = #tpu.dot_dimension_numbers<[1], [0], [0], [1], [0, 0, 1, 1], [], []>} : vector<8x20xbf16>, vector<20x6xbf16>, vector<8x6xf32> -> vector<8x6xf32>
    %146 = vector.broadcast %10 : vector<1x6xf32> to vector<8x6xf32>
    %147 = arith.addf %145, %146 : vector<8x6xf32>
    %cst_90 = arith.constant 0.000000e+00 : f32
    %148 = vector.broadcast %cst_90 : f32 to vector<8x6xf32>
    %149 = arith.maximumf %147, %148 : vector<8x6xf32>
    %150 = tpu.concatenate %35, %38, %41, %44, %47 in 1 : vector<8x4xbf16>, vector<8x4xbf16>, vector<8x4xbf16>, vector<8x4xbf16>, vector<8x4xbf16> -> vector<8x20xbf16>
    %cst_91 = arith.constant dense<0.000000e+00> : vector<8x6xf32>
    %151 = tpu.matmul %150, %1, %cst_91 {dimension_numbers = #tpu.dot_dimension_numbers<[1], [0], [0], [1], [0, 0, 1, 1], [], []>} : vector<8x20xbf16>, vector<20x6xbf16>, vector<8x6xf32> -> vector<8x6xf32>
    %152 = vector.broadcast %10 : vector<1x6xf32> to vector<8x6xf32>
    %153 = arith.addf %151, %152 : vector<8x6xf32>
    %cst_92 = arith.constant 0.000000e+00 : f32
    %154 = vector.broadcast %cst_92 : f32 to vector<8x6xf32>
    %155 = arith.maximumf %153, %154 : vector<8x6xf32>
    %156 = tpu.concatenate %38, %41, %44, %47, %50 in 1 : vector<8x4xbf16>, vector<8x4xbf16>, vector<8x4xbf16>, vector<8x4xbf16>, vector<8x4xbf16> -> vector<8x20xbf16>
    %cst_93 = arith.constant dense<0.000000e+00> : vector<8x6xf32>
    %157 = tpu.matmul %156, %1, %cst_93 {dimension_numbers = #tpu.dot_dimension_numbers<[1], [0], [0], [1], [0, 0, 1, 1], [], []>} : vector<8x20xbf16>, vector<20x6xbf16>, vector<8x6xf32> -> vector<8x6xf32>
    %158 = vector.broadcast %10 : vector<1x6xf32> to vector<8x6xf32>
    %159 = arith.addf %157, %158 : vector<8x6xf32>
    %cst_94 = arith.constant 0.000000e+00 : f32
    %160 = vector.broadcast %cst_94 : f32 to vector<8x6xf32>
    %161 = arith.maximumf %159, %160 : vector<8x6xf32>
    %162 = tpu.concatenate %41, %44, %47, %50, %53 in 1 : vector<8x4xbf16>, vector<8x4xbf16>, vector<8x4xbf16>, vector<8x4xbf16>, vector<8x4xbf16> -> vector<8x20xbf16>
    %cst_95 = arith.constant dense<0.000000e+00> : vector<8x6xf32>
    %163 = tpu.matmul %162, %1, %cst_95 {dimension_numbers = #tpu.dot_dimension_numbers<[1], [0], [0], [1], [0, 0, 1, 1], [], []>} : vector<8x20xbf16>, vector<20x6xbf16>, vector<8x6xf32> -> vector<8x6xf32>
    %164 = vector.broadcast %10 : vector<1x6xf32> to vector<8x6xf32>
    %165 = arith.addf %163, %164 : vector<8x6xf32>
    %cst_96 = arith.constant 0.000000e+00 : f32
    %166 = vector.broadcast %cst_96 : f32 to vector<8x6xf32>
    %167 = arith.maximumf %165, %166 : vector<8x6xf32>
    %168 = tpu.concatenate %44, %47, %50, %53, %56 in 1 : vector<8x4xbf16>, vector<8x4xbf16>, vector<8x4xbf16>, vector<8x4xbf16>, vector<8x4xbf16> -> vector<8x20xbf16>
    %cst_97 = arith.constant dense<0.000000e+00> : vector<8x6xf32>
    %169 = tpu.matmul %168, %1, %cst_97 {dimension_numbers = #tpu.dot_dimension_numbers<[1], [0], [0], [1], [0, 0, 1, 1], [], []>} : vector<8x20xbf16>, vector<20x6xbf16>, vector<8x6xf32> -> vector<8x6xf32>
    %170 = vector.broadcast %10 : vector<1x6xf32> to vector<8x6xf32>
    %171 = arith.addf %169, %170 : vector<8x6xf32>
    %cst_98 = arith.constant 0.000000e+00 : f32
    %172 = vector.broadcast %cst_98 : f32 to vector<8x6xf32>
    %173 = arith.maximumf %171, %172 : vector<8x6xf32>
    %174 = tpu.concatenate %47, %50, %53, %56, %59 in 1 : vector<8x4xbf16>, vector<8x4xbf16>, vector<8x4xbf16>, vector<8x4xbf16>, vector<8x4xbf16> -> vector<8x20xbf16>
    %cst_99 = arith.constant dense<0.000000e+00> : vector<8x6xf32>
    %175 = tpu.matmul %174, %1, %cst_99 {dimension_numbers = #tpu.dot_dimension_numbers<[1], [0], [0], [1], [0, 0, 1, 1], [], []>} : vector<8x20xbf16>, vector<20x6xbf16>, vector<8x6xf32> -> vector<8x6xf32>
    %176 = vector.broadcast %10 : vector<1x6xf32> to vector<8x6xf32>
    %177 = arith.addf %175, %176 : vector<8x6xf32>
    %cst_100 = arith.constant 0.000000e+00 : f32
    %178 = vector.broadcast %cst_100 : f32 to vector<8x6xf32>
    %179 = arith.maximumf %177, %178 : vector<8x6xf32>
    %180 = tpu.concatenate %50, %53, %56, %59, %62 in 1 : vector<8x4xbf16>, vector<8x4xbf16>, vector<8x4xbf16>, vector<8x4xbf16>, vector<8x4xbf16> -> vector<8x20xbf16>
    %cst_101 = arith.constant dense<0.000000e+00> : vector<8x6xf32>
    %181 = tpu.matmul %180, %1, %cst_101 {dimension_numbers = #tpu.dot_dimension_numbers<[1], [0], [0], [1], [0, 0, 1, 1], [], []>} : vector<8x20xbf16>, vector<20x6xbf16>, vector<8x6xf32> -> vector<8x6xf32>
    %182 = vector.broadcast %10 : vector<1x6xf32> to vector<8x6xf32>
    %183 = arith.addf %181, %182 : vector<8x6xf32>
    %cst_102 = arith.constant 0.000000e+00 : f32
    %184 = vector.broadcast %cst_102 : f32 to vector<8x6xf32>
    %185 = arith.maximumf %183, %184 : vector<8x6xf32>
    %186 = tpu.concatenate %53, %56, %59, %62, %65 in 1 : vector<8x4xbf16>, vector<8x4xbf16>, vector<8x4xbf16>, vector<8x4xbf16>, vector<8x4xbf16> -> vector<8x20xbf16>
    %cst_103 = arith.constant dense<0.000000e+00> : vector<8x6xf32>
    %187 = tpu.matmul %186, %1, %cst_103 {dimension_numbers = #tpu.dot_dimension_numbers<[1], [0], [0], [1], [0, 0, 1, 1], [], []>} : vector<8x20xbf16>, vector<20x6xbf16>, vector<8x6xf32> -> vector<8x6xf32>
    %188 = vector.broadcast %10 : vector<1x6xf32> to vector<8x6xf32>
    %189 = arith.addf %187, %188 : vector<8x6xf32>
    %cst_104 = arith.constant 0.000000e+00 : f32
    %190 = vector.broadcast %cst_104 : f32 to vector<8x6xf32>
    %191 = arith.maximumf %189, %190 : vector<8x6xf32>
    %192 = tpu.concatenate %56, %59, %62, %65, %68 in 1 : vector<8x4xbf16>, vector<8x4xbf16>, vector<8x4xbf16>, vector<8x4xbf16>, vector<8x4xbf16> -> vector<8x20xbf16>
    %cst_105 = arith.constant dense<0.000000e+00> : vector<8x6xf32>
    %193 = tpu.matmul %192, %1, %cst_105 {dimension_numbers = #tpu.dot_dimension_numbers<[1], [0], [0], [1], [0, 0, 1, 1], [], []>} : vector<8x20xbf16>, vector<20x6xbf16>, vector<8x6xf32> -> vector<8x6xf32>
    %194 = vector.broadcast %10 : vector<1x6xf32> to vector<8x6xf32>
    %195 = arith.addf %193, %194 : vector<8x6xf32>
    %cst_106 = arith.constant 0.000000e+00 : f32
    %196 = vector.broadcast %cst_106 : f32 to vector<8x6xf32>
    %197 = arith.maximumf %195, %196 : vector<8x6xf32>
    %198 = tpu.concatenate %59, %62, %65, %68, %71 in 1 : vector<8x4xbf16>, vector<8x4xbf16>, vector<8x4xbf16>, vector<8x4xbf16>, vector<8x4xbf16> -> vector<8x20xbf16>
    %cst_107 = arith.constant dense<0.000000e+00> : vector<8x6xf32>
    %199 = tpu.matmul %198, %1, %cst_107 {dimension_numbers = #tpu.dot_dimension_numbers<[1], [0], [0], [1], [0, 0, 1, 1], [], []>} : vector<8x20xbf16>, vector<20x6xbf16>, vector<8x6xf32> -> vector<8x6xf32>
    %200 = vector.broadcast %10 : vector<1x6xf32> to vector<8x6xf32>
    %201 = arith.addf %199, %200 : vector<8x6xf32>
    %cst_108 = arith.constant 0.000000e+00 : f32
    %202 = vector.broadcast %cst_108 : f32 to vector<8x6xf32>
    %203 = arith.maximumf %201, %202 : vector<8x6xf32>
    %204 = tpu.concatenate %62, %65, %68, %71, %74 in 1 : vector<8x4xbf16>, vector<8x4xbf16>, vector<8x4xbf16>, vector<8x4xbf16>, vector<8x4xbf16> -> vector<8x20xbf16>
    %cst_109 = arith.constant dense<0.000000e+00> : vector<8x6xf32>
    %205 = tpu.matmul %204, %1, %cst_109 {dimension_numbers = #tpu.dot_dimension_numbers<[1], [0], [0], [1], [0, 0, 1, 1], [], []>} : vector<8x20xbf16>, vector<20x6xbf16>, vector<8x6xf32> -> vector<8x6xf32>
    %206 = vector.broadcast %10 : vector<1x6xf32> to vector<8x6xf32>
    %207 = arith.addf %205, %206 : vector<8x6xf32>
    %cst_110 = arith.constant 0.000000e+00 : f32
    %208 = vector.broadcast %cst_110 : f32 to vector<8x6xf32>
    %209 = arith.maximumf %207, %208 : vector<8x6xf32>
    %210 = tpu.concatenate %65, %68, %71, %74, %77 in 1 : vector<8x4xbf16>, vector<8x4xbf16>, vector<8x4xbf16>, vector<8x4xbf16>, vector<8x4xbf16> -> vector<8x20xbf16>
    %cst_111 = arith.constant dense<0.000000e+00> : vector<8x6xf32>
    %211 = tpu.matmul %210, %1, %cst_111 {dimension_numbers = #tpu.dot_dimension_numbers<[1], [0], [0], [1], [0, 0, 1, 1], [], []>} : vector<8x20xbf16>, vector<20x6xbf16>, vector<8x6xf32> -> vector<8x6xf32>
    %212 = vector.broadcast %10 : vector<1x6xf32> to vector<8x6xf32>
    %213 = arith.addf %211, %212 : vector<8x6xf32>
    %cst_112 = arith.constant 0.000000e+00 : f32
    %214 = vector.broadcast %cst_112 : f32 to vector<8x6xf32>
    %215 = arith.maximumf %213, %214 : vector<8x6xf32>
    %216 = tpu.concatenate %68, %71, %74, %77, %80 in 1 : vector<8x4xbf16>, vector<8x4xbf16>, vector<8x4xbf16>, vector<8x4xbf16>, vector<8x4xbf16> -> vector<8x20xbf16>
    %cst_113 = arith.constant dense<0.000000e+00> : vector<8x6xf32>
    %217 = tpu.matmul %216, %1, %cst_113 {dimension_numbers = #tpu.dot_dimension_numbers<[1], [0], [0], [1], [0, 0, 1, 1], [], []>} : vector<8x20xbf16>, vector<20x6xbf16>, vector<8x6xf32> -> vector<8x6xf32>
    %218 = vector.broadcast %10 : vector<1x6xf32> to vector<8x6xf32>
    %219 = arith.addf %217, %218 : vector<8x6xf32>
    %cst_114 = arith.constant 0.000000e+00 : f32
    %220 = vector.broadcast %cst_114 : f32 to vector<8x6xf32>
    %221 = arith.maximumf %219, %220 : vector<8x6xf32>
    %222 = tpu.concatenate %71, %74, %77, %80, %83 in 1 : vector<8x4xbf16>, vector<8x4xbf16>, vector<8x4xbf16>, vector<8x4xbf16>, vector<8x4xbf16> -> vector<8x20xbf16>
    %cst_115 = arith.constant dense<0.000000e+00> : vector<8x6xf32>
    %223 = tpu.matmul %222, %1, %cst_115 {dimension_numbers = #tpu.dot_dimension_numbers<[1], [0], [0], [1], [0, 0, 1, 1], [], []>} : vector<8x20xbf16>, vector<20x6xbf16>, vector<8x6xf32> -> vector<8x6xf32>
    %224 = vector.broadcast %10 : vector<1x6xf32> to vector<8x6xf32>
    %225 = arith.addf %223, %224 : vector<8x6xf32>
    %cst_116 = arith.constant 0.000000e+00 : f32
    %226 = vector.broadcast %cst_116 : f32 to vector<8x6xf32>
    %227 = arith.maximumf %225, %226 : vector<8x6xf32>
    %228 = tpu.concatenate %74, %77, %80, %83, %86 in 1 : vector<8x4xbf16>, vector<8x4xbf16>, vector<8x4xbf16>, vector<8x4xbf16>, vector<8x4xbf16> -> vector<8x20xbf16>
    %cst_117 = arith.constant dense<0.000000e+00> : vector<8x6xf32>
    %229 = tpu.matmul %228, %1, %cst_117 {dimension_numbers = #tpu.dot_dimension_numbers<[1], [0], [0], [1], [0, 0, 1, 1], [], []>} : vector<8x20xbf16>, vector<20x6xbf16>, vector<8x6xf32> -> vector<8x6xf32>
    %230 = vector.broadcast %10 : vector<1x6xf32> to vector<8x6xf32>
    %231 = arith.addf %229, %230 : vector<8x6xf32>
    %cst_118 = arith.constant 0.000000e+00 : f32
    %232 = vector.broadcast %cst_118 : f32 to vector<8x6xf32>
    %233 = arith.maximumf %231, %232 : vector<8x6xf32>
    %234 = tpu.concatenate %77, %80, %83, %86, %89 in 1 : vector<8x4xbf16>, vector<8x4xbf16>, vector<8x4xbf16>, vector<8x4xbf16>, vector<8x4xbf16> -> vector<8x20xbf16>
    %cst_119 = arith.constant dense<0.000000e+00> : vector<8x6xf32>
    %235 = tpu.matmul %234, %1, %cst_119 {dimension_numbers = #tpu.dot_dimension_numbers<[1], [0], [0], [1], [0, 0, 1, 1], [], []>} : vector<8x20xbf16>, vector<20x6xbf16>, vector<8x6xf32> -> vector<8x6xf32>
    %236 = vector.broadcast %10 : vector<1x6xf32> to vector<8x6xf32>
    %237 = arith.addf %235, %236 : vector<8x6xf32>
    %cst_120 = arith.constant 0.000000e+00 : f32
    %238 = vector.broadcast %cst_120 : f32 to vector<8x6xf32>
    %239 = arith.maximumf %237, %238 : vector<8x6xf32>
    %240 = tpu.concatenate %80, %83, %86, %89, %92 in 1 : vector<8x4xbf16>, vector<8x4xbf16>, vector<8x4xbf16>, vector<8x4xbf16>, vector<8x4xbf16> -> vector<8x20xbf16>
    %cst_121 = arith.constant dense<0.000000e+00> : vector<8x6xf32>
    %241 = tpu.matmul %240, %1, %cst_121 {dimension_numbers = #tpu.dot_dimension_numbers<[1], [0], [0], [1], [0, 0, 1, 1], [], []>} : vector<8x20xbf16>, vector<20x6xbf16>, vector<8x6xf32> -> vector<8x6xf32>
    %242 = vector.broadcast %10 : vector<1x6xf32> to vector<8x6xf32>
    %243 = arith.addf %241, %242 : vector<8x6xf32>
    %cst_122 = arith.constant 0.000000e+00 : f32
    %244 = vector.broadcast %cst_122 : f32 to vector<8x6xf32>
    %245 = arith.maximumf %243, %244 : vector<8x6xf32>
    %246 = tpu.concatenate %83, %86, %89, %92, %95 in 1 : vector<8x4xbf16>, vector<8x4xbf16>, vector<8x4xbf16>, vector<8x4xbf16>, vector<8x4xbf16> -> vector<8x20xbf16>
    %cst_123 = arith.constant dense<0.000000e+00> : vector<8x6xf32>
    %247 = tpu.matmul %246, %1, %cst_123 {dimension_numbers = #tpu.dot_dimension_numbers<[1], [0], [0], [1], [0, 0, 1, 1], [], []>} : vector<8x20xbf16>, vector<20x6xbf16>, vector<8x6xf32> -> vector<8x6xf32>
    %248 = vector.broadcast %10 : vector<1x6xf32> to vector<8x6xf32>
    %249 = arith.addf %247, %248 : vector<8x6xf32>
    %cst_124 = arith.constant 0.000000e+00 : f32
    %250 = vector.broadcast %cst_124 : f32 to vector<8x6xf32>
    %251 = arith.maximumf %249, %250 : vector<8x6xf32>
    %252 = tpu.concatenate %86, %89, %92, %95, %98 in 1 : vector<8x4xbf16>, vector<8x4xbf16>, vector<8x4xbf16>, vector<8x4xbf16>, vector<8x4xbf16> -> vector<8x20xbf16>
    %cst_125 = arith.constant dense<0.000000e+00> : vector<8x6xf32>
    %253 = tpu.matmul %252, %1, %cst_125 {dimension_numbers = #tpu.dot_dimension_numbers<[1], [0], [0], [1], [0, 0, 1, 1], [], []>} : vector<8x20xbf16>, vector<20x6xbf16>, vector<8x6xf32> -> vector<8x6xf32>
    %254 = vector.broadcast %10 : vector<1x6xf32> to vector<8x6xf32>
    %255 = arith.addf %253, %254 : vector<8x6xf32>
    %cst_126 = arith.constant 0.000000e+00 : f32
    %256 = vector.broadcast %cst_126 : f32 to vector<8x6xf32>
    %257 = arith.maximumf %255, %256 : vector<8x6xf32>
    %258 = tpu.concatenate %89, %92, %95, %98, %101 in 1 : vector<8x4xbf16>, vector<8x4xbf16>, vector<8x4xbf16>, vector<8x4xbf16>, vector<8x4xbf16> -> vector<8x20xbf16>
    %cst_127 = arith.constant dense<0.000000e+00> : vector<8x6xf32>
    %259 = tpu.matmul %258, %1, %cst_127 {dimension_numbers = #tpu.dot_dimension_numbers<[1], [0], [0], [1], [0, 0, 1, 1], [], []>} : vector<8x20xbf16>, vector<20x6xbf16>, vector<8x6xf32> -> vector<8x6xf32>
    %260 = vector.broadcast %10 : vector<1x6xf32> to vector<8x6xf32>
    %261 = arith.addf %259, %260 : vector<8x6xf32>
    %cst_128 = arith.constant 0.000000e+00 : f32
    %262 = vector.broadcast %cst_128 : f32 to vector<8x6xf32>
    %263 = arith.maximumf %261, %262 : vector<8x6xf32>
    %264 = tpu.concatenate %92, %95, %98, %101, %104 in 1 : vector<8x4xbf16>, vector<8x4xbf16>, vector<8x4xbf16>, vector<8x4xbf16>, vector<8x4xbf16> -> vector<8x20xbf16>
    %cst_129 = arith.constant dense<0.000000e+00> : vector<8x6xf32>
    %265 = tpu.matmul %264, %1, %cst_129 {dimension_numbers = #tpu.dot_dimension_numbers<[1], [0], [0], [1], [0, 0, 1, 1], [], []>} : vector<8x20xbf16>, vector<20x6xbf16>, vector<8x6xf32> -> vector<8x6xf32>
    %266 = vector.broadcast %10 : vector<1x6xf32> to vector<8x6xf32>
    %267 = arith.addf %265, %266 : vector<8x6xf32>
    %cst_130 = arith.constant 0.000000e+00 : f32
    %268 = vector.broadcast %cst_130 : f32 to vector<8x6xf32>
    %269 = arith.maximumf %267, %268 : vector<8x6xf32>
    %270 = tpu.concatenate %95, %98, %101, %104, %107 in 1 : vector<8x4xbf16>, vector<8x4xbf16>, vector<8x4xbf16>, vector<8x4xbf16>, vector<8x4xbf16> -> vector<8x20xbf16>
    %cst_131 = arith.constant dense<0.000000e+00> : vector<8x6xf32>
    %271 = tpu.matmul %270, %1, %cst_131 {dimension_numbers = #tpu.dot_dimension_numbers<[1], [0], [0], [1], [0, 0, 1, 1], [], []>} : vector<8x20xbf16>, vector<20x6xbf16>, vector<8x6xf32> -> vector<8x6xf32>
    %272 = vector.broadcast %10 : vector<1x6xf32> to vector<8x6xf32>
    %273 = arith.addf %271, %272 : vector<8x6xf32>
    %cst_132 = arith.constant 0.000000e+00 : f32
    %274 = vector.broadcast %cst_132 : f32 to vector<8x6xf32>
    %275 = arith.maximumf %273, %274 : vector<8x6xf32>
    %276 = arith.maximumf %113, %119 : vector<8x6xf32>
    %277 = arith.truncf %276 : vector<8x6xf32> to vector<8x6xbf16>
    %278 = arith.maximumf %125, %131 : vector<8x6xf32>
    %279 = arith.truncf %278 : vector<8x6xf32> to vector<8x6xbf16>
    %280 = arith.maximumf %137, %143 : vector<8x6xf32>
    %281 = arith.truncf %280 : vector<8x6xf32> to vector<8x6xbf16>
    %282 = arith.maximumf %149, %155 : vector<8x6xf32>
    %283 = arith.truncf %282 : vector<8x6xf32> to vector<8x6xbf16>
    %284 = arith.maximumf %161, %167 : vector<8x6xf32>
    %285 = arith.truncf %284 : vector<8x6xf32> to vector<8x6xbf16>
    %286 = arith.maximumf %173, %179 : vector<8x6xf32>
    %287 = arith.truncf %286 : vector<8x6xf32> to vector<8x6xbf16>
    %288 = arith.maximumf %185, %191 : vector<8x6xf32>
    %289 = arith.truncf %288 : vector<8x6xf32> to vector<8x6xbf16>
    %290 = arith.maximumf %197, %203 : vector<8x6xf32>
    %291 = arith.truncf %290 : vector<8x6xf32> to vector<8x6xbf16>
    %292 = arith.maximumf %209, %215 : vector<8x6xf32>
    %293 = arith.truncf %292 : vector<8x6xf32> to vector<8x6xbf16>
    %294 = arith.maximumf %221, %227 : vector<8x6xf32>
    %295 = arith.truncf %294 : vector<8x6xf32> to vector<8x6xbf16>
    %296 = arith.maximumf %233, %239 : vector<8x6xf32>
    %297 = arith.truncf %296 : vector<8x6xf32> to vector<8x6xbf16>
    %298 = arith.maximumf %245, %251 : vector<8x6xf32>
    %299 = arith.truncf %298 : vector<8x6xf32> to vector<8x6xbf16>
    %300 = arith.maximumf %257, %263 : vector<8x6xf32>
    %301 = arith.truncf %300 : vector<8x6xf32> to vector<8x6xbf16>
    %302 = arith.maximumf %269, %275 : vector<8x6xf32>
    %303 = arith.truncf %302 : vector<8x6xf32> to vector<8x6xbf16>
    %304 = tpu.concatenate %277, %279, %281, %283, %285 in 1 : vector<8x6xbf16>, vector<8x6xbf16>, vector<8x6xbf16>, vector<8x6xbf16>, vector<8x6xbf16> -> vector<8x30xbf16>
    %cst_133 = arith.constant dense<0.000000e+00> : vector<8x16xf32>
    %305 = tpu.matmul %304, %3, %cst_133 {dimension_numbers = #tpu.dot_dimension_numbers<[1], [0], [0], [1], [0, 0, 1, 1], [], []>} : vector<8x30xbf16>, vector<30x16xbf16>, vector<8x16xf32> -> vector<8x16xf32>
    %306 = vector.broadcast %11 : vector<1x16xf32> to vector<8x16xf32>
    %307 = arith.addf %305, %306 : vector<8x16xf32>
    %cst_134 = arith.constant 0.000000e+00 : f32
    %308 = vector.broadcast %cst_134 : f32 to vector<8x16xf32>
    %309 = arith.maximumf %307, %308 : vector<8x16xf32>
    %310 = tpu.concatenate %279, %281, %283, %285, %287 in 1 : vector<8x6xbf16>, vector<8x6xbf16>, vector<8x6xbf16>, vector<8x6xbf16>, vector<8x6xbf16> -> vector<8x30xbf16>
    %cst_135 = arith.constant dense<0.000000e+00> : vector<8x16xf32>
    %311 = tpu.matmul %310, %3, %cst_135 {dimension_numbers = #tpu.dot_dimension_numbers<[1], [0], [0], [1], [0, 0, 1, 1], [], []>} : vector<8x30xbf16>, vector<30x16xbf16>, vector<8x16xf32> -> vector<8x16xf32>
    %312 = vector.broadcast %11 : vector<1x16xf32> to vector<8x16xf32>
    %313 = arith.addf %311, %312 : vector<8x16xf32>
    %cst_136 = arith.constant 0.000000e+00 : f32
    %314 = vector.broadcast %cst_136 : f32 to vector<8x16xf32>
    %315 = arith.maximumf %313, %314 : vector<8x16xf32>
    %316 = tpu.concatenate %281, %283, %285, %287, %289 in 1 : vector<8x6xbf16>, vector<8x6xbf16>, vector<8x6xbf16>, vector<8x6xbf16>, vector<8x6xbf16> -> vector<8x30xbf16>
    %cst_137 = arith.constant dense<0.000000e+00> : vector<8x16xf32>
    %317 = tpu.matmul %316, %3, %cst_137 {dimension_numbers = #tpu.dot_dimension_numbers<[1], [0], [0], [1], [0, 0, 1, 1], [], []>} : vector<8x30xbf16>, vector<30x16xbf16>, vector<8x16xf32> -> vector<8x16xf32>
    %318 = vector.broadcast %11 : vector<1x16xf32> to vector<8x16xf32>
    %319 = arith.addf %317, %318 : vector<8x16xf32>
    %cst_138 = arith.constant 0.000000e+00 : f32
    %320 = vector.broadcast %cst_138 : f32 to vector<8x16xf32>
    %321 = arith.maximumf %319, %320 : vector<8x16xf32>
    %322 = tpu.concatenate %283, %285, %287, %289, %291 in 1 : vector<8x6xbf16>, vector<8x6xbf16>, vector<8x6xbf16>, vector<8x6xbf16>, vector<8x6xbf16> -> vector<8x30xbf16>
    %cst_139 = arith.constant dense<0.000000e+00> : vector<8x16xf32>
    %323 = tpu.matmul %322, %3, %cst_139 {dimension_numbers = #tpu.dot_dimension_numbers<[1], [0], [0], [1], [0, 0, 1, 1], [], []>} : vector<8x30xbf16>, vector<30x16xbf16>, vector<8x16xf32> -> vector<8x16xf32>
    %324 = vector.broadcast %11 : vector<1x16xf32> to vector<8x16xf32>
    %325 = arith.addf %323, %324 : vector<8x16xf32>
    %cst_140 = arith.constant 0.000000e+00 : f32
    %326 = vector.broadcast %cst_140 : f32 to vector<8x16xf32>
    %327 = arith.maximumf %325, %326 : vector<8x16xf32>
    %328 = tpu.concatenate %285, %287, %289, %291, %293 in 1 : vector<8x6xbf16>, vector<8x6xbf16>, vector<8x6xbf16>, vector<8x6xbf16>, vector<8x6xbf16> -> vector<8x30xbf16>
    %cst_141 = arith.constant dense<0.000000e+00> : vector<8x16xf32>
    %329 = tpu.matmul %328, %3, %cst_141 {dimension_numbers = #tpu.dot_dimension_numbers<[1], [0], [0], [1], [0, 0, 1, 1], [], []>} : vector<8x30xbf16>, vector<30x16xbf16>, vector<8x16xf32> -> vector<8x16xf32>
    %330 = vector.broadcast %11 : vector<1x16xf32> to vector<8x16xf32>
    %331 = arith.addf %329, %330 : vector<8x16xf32>
    %cst_142 = arith.constant 0.000000e+00 : f32
    %332 = vector.broadcast %cst_142 : f32 to vector<8x16xf32>
    %333 = arith.maximumf %331, %332 : vector<8x16xf32>
    %334 = tpu.concatenate %287, %289, %291, %293, %295 in 1 : vector<8x6xbf16>, vector<8x6xbf16>, vector<8x6xbf16>, vector<8x6xbf16>, vector<8x6xbf16> -> vector<8x30xbf16>
    %cst_143 = arith.constant dense<0.000000e+00> : vector<8x16xf32>
    %335 = tpu.matmul %334, %3, %cst_143 {dimension_numbers = #tpu.dot_dimension_numbers<[1], [0], [0], [1], [0, 0, 1, 1], [], []>} : vector<8x30xbf16>, vector<30x16xbf16>, vector<8x16xf32> -> vector<8x16xf32>
    %336 = vector.broadcast %11 : vector<1x16xf32> to vector<8x16xf32>
    %337 = arith.addf %335, %336 : vector<8x16xf32>
    %cst_144 = arith.constant 0.000000e+00 : f32
    %338 = vector.broadcast %cst_144 : f32 to vector<8x16xf32>
    %339 = arith.maximumf %337, %338 : vector<8x16xf32>
    %340 = tpu.concatenate %289, %291, %293, %295, %297 in 1 : vector<8x6xbf16>, vector<8x6xbf16>, vector<8x6xbf16>, vector<8x6xbf16>, vector<8x6xbf16> -> vector<8x30xbf16>
    %cst_145 = arith.constant dense<0.000000e+00> : vector<8x16xf32>
    %341 = tpu.matmul %340, %3, %cst_145 {dimension_numbers = #tpu.dot_dimension_numbers<[1], [0], [0], [1], [0, 0, 1, 1], [], []>} : vector<8x30xbf16>, vector<30x16xbf16>, vector<8x16xf32> -> vector<8x16xf32>
    %342 = vector.broadcast %11 : vector<1x16xf32> to vector<8x16xf32>
    %343 = arith.addf %341, %342 : vector<8x16xf32>
    %cst_146 = arith.constant 0.000000e+00 : f32
    %344 = vector.broadcast %cst_146 : f32 to vector<8x16xf32>
    %345 = arith.maximumf %343, %344 : vector<8x16xf32>
    %346 = tpu.concatenate %291, %293, %295, %297, %299 in 1 : vector<8x6xbf16>, vector<8x6xbf16>, vector<8x6xbf16>, vector<8x6xbf16>, vector<8x6xbf16> -> vector<8x30xbf16>
    %cst_147 = arith.constant dense<0.000000e+00> : vector<8x16xf32>
    %347 = tpu.matmul %346, %3, %cst_147 {dimension_numbers = #tpu.dot_dimension_numbers<[1], [0], [0], [1], [0, 0, 1, 1], [], []>} : vector<8x30xbf16>, vector<30x16xbf16>, vector<8x16xf32> -> vector<8x16xf32>
    %348 = vector.broadcast %11 : vector<1x16xf32> to vector<8x16xf32>
    %349 = arith.addf %347, %348 : vector<8x16xf32>
    %cst_148 = arith.constant 0.000000e+00 : f32
    %350 = vector.broadcast %cst_148 : f32 to vector<8x16xf32>
    %351 = arith.maximumf %349, %350 : vector<8x16xf32>
    %352 = tpu.concatenate %293, %295, %297, %299, %301 in 1 : vector<8x6xbf16>, vector<8x6xbf16>, vector<8x6xbf16>, vector<8x6xbf16>, vector<8x6xbf16> -> vector<8x30xbf16>
    %cst_149 = arith.constant dense<0.000000e+00> : vector<8x16xf32>
    %353 = tpu.matmul %352, %3, %cst_149 {dimension_numbers = #tpu.dot_dimension_numbers<[1], [0], [0], [1], [0, 0, 1, 1], [], []>} : vector<8x30xbf16>, vector<30x16xbf16>, vector<8x16xf32> -> vector<8x16xf32>
    %354 = vector.broadcast %11 : vector<1x16xf32> to vector<8x16xf32>
    %355 = arith.addf %353, %354 : vector<8x16xf32>
    %cst_150 = arith.constant 0.000000e+00 : f32
    %356 = vector.broadcast %cst_150 : f32 to vector<8x16xf32>
    %357 = arith.maximumf %355, %356 : vector<8x16xf32>
    %358 = tpu.concatenate %295, %297, %299, %301, %303 in 1 : vector<8x6xbf16>, vector<8x6xbf16>, vector<8x6xbf16>, vector<8x6xbf16>, vector<8x6xbf16> -> vector<8x30xbf16>
    %cst_151 = arith.constant dense<0.000000e+00> : vector<8x16xf32>
    %359 = tpu.matmul %358, %3, %cst_151 {dimension_numbers = #tpu.dot_dimension_numbers<[1], [0], [0], [1], [0, 0, 1, 1], [], []>} : vector<8x30xbf16>, vector<30x16xbf16>, vector<8x16xf32> -> vector<8x16xf32>
    %360 = vector.broadcast %11 : vector<1x16xf32> to vector<8x16xf32>
    %361 = arith.addf %359, %360 : vector<8x16xf32>
    %cst_152 = arith.constant 0.000000e+00 : f32
    %362 = vector.broadcast %cst_152 : f32 to vector<8x16xf32>
    %363 = arith.maximumf %361, %362 : vector<8x16xf32>
    %364 = arith.maximumf %309, %315 : vector<8x16xf32>
    %365 = arith.truncf %364 : vector<8x16xf32> to vector<8x16xbf16>
    %366 = arith.maximumf %321, %327 : vector<8x16xf32>
    %367 = arith.truncf %366 : vector<8x16xf32> to vector<8x16xbf16>
    %368 = arith.maximumf %333, %339 : vector<8x16xf32>
    %369 = arith.truncf %368 : vector<8x16xf32> to vector<8x16xbf16>
    %370 = arith.maximumf %345, %351 : vector<8x16xf32>
    %371 = arith.truncf %370 : vector<8x16xf32> to vector<8x16xbf16>
    %372 = arith.maximumf %357, %363 : vector<8x16xf32>
    %373 = arith.truncf %372 : vector<8x16xf32> to vector<8x16xbf16>
    %374 = tpu.concatenate %365, %367, %369, %371, %373 in 1 : vector<8x16xbf16>, vector<8x16xbf16>, vector<8x16xbf16>, vector<8x16xbf16>, vector<8x16xbf16> -> vector<8x80xbf16>
    %cst_153 = arith.constant dense<0.000000e+00> : vector<8x120xf32>
    %375 = tpu.matmul %374, %5, %cst_153 {dimension_numbers = #tpu.dot_dimension_numbers<[1], [0], [0], [1], [0, 0, 1, 1], [], []>} : vector<8x80xbf16>, vector<80x120xbf16>, vector<8x120xf32> -> vector<8x120xf32>
    %c0_154 = arith.constant 0 : index
    %c0_155 = arith.constant 0 : index
    %376 = vector.load %arg7[%c0_154, %c0_155] : memref<1x120xf32, #tpu.memory_space<vmem>>, vector<1x120xf32>
    %377 = vector.broadcast %376 : vector<1x120xf32> to vector<8x120xf32>
    %378 = arith.addf %375, %377 : vector<8x120xf32>
    %cst_156 = arith.constant 0.000000e+00 : f32
    %379 = vector.broadcast %cst_156 : f32 to vector<8x120xf32>
    %380 = arith.maximumf %378, %379 : vector<8x120xf32>
    %381 = arith.truncf %380 : vector<8x120xf32> to vector<8x120xbf16>
    %cst_157 = arith.constant dense<0.000000e+00> : vector<8x84xf32>
    %382 = tpu.matmul %381, %7, %cst_157 {dimension_numbers = #tpu.dot_dimension_numbers<[1], [0], [0], [1], [0, 0, 1, 1], [], []>} : vector<8x120xbf16>, vector<120x84xbf16>, vector<8x84xf32> -> vector<8x84xf32>
    %c0_158 = arith.constant 0 : index
    %c0_159 = arith.constant 0 : index
    %383 = vector.load %arg9[%c0_158, %c0_159] : memref<1x84xf32, #tpu.memory_space<vmem>>, vector<1x84xf32>
    %384 = vector.broadcast %383 : vector<1x84xf32> to vector<8x84xf32>
    %385 = arith.addf %382, %384 : vector<8x84xf32>
    %cst_160 = arith.constant 0.000000e+00 : f32
    %386 = vector.broadcast %cst_160 : f32 to vector<8x84xf32>
    %387 = arith.maximumf %385, %386 : vector<8x84xf32>
    %388 = arith.truncf %387 : vector<8x84xf32> to vector<8x84xbf16>
    %cst_161 = arith.constant dense<0.000000e+00> : vector<8x128xf32>
    %389 = tpu.matmul %388, %9, %cst_161 {dimension_numbers = #tpu.dot_dimension_numbers<[1], [0], [0], [1], [0, 0, 1, 1], [], []>} : vector<8x84xbf16>, vector<84x128xbf16>, vector<8x128xf32> -> vector<8x128xf32>
    %c0_162 = arith.constant 0 : index
    %c0_163 = arith.constant 0 : index
    %390 = vector.load %arg11[%c0_162, %c0_163] : memref<1x128xf32, #tpu.memory_space<vmem>>, vector<1x128xf32>
    %391 = vector.broadcast %390 : vector<1x128xf32> to vector<8x128xf32>
    %392 = arith.addf %389, %391 : vector<8x128xf32>
    %c0_164 = arith.constant 0 : index
    %c0_165 = arith.constant 0 : index
    %393 = vector.load %arg12[%c0_164, %c0_165] : memref<8x128xf32, #tpu.memory_space<vmem>>, vector<8x128xf32>
    tpu.vector_store %arg12[%c0_164, %c0_165], %392 {strides = array<i32>} : memref<8x128xf32, #tpu.memory_space<vmem>>, vector<8x128xf32>,
    return
  }
  func.func @transform_0(%arg0: i32) -> (i32, i32, i32) {
    %c0_i32 = arith.constant 0 : i32
    %c0_i32_0 = arith.constant 0 : i32
    %c0_i32_1 = arith.constant 0 : i32
    return %c0_i32, %arg0, %c0_i32_0 : i32, i32, i32
  }
  func.func @transform_1(%arg0: i32) -> (i32, i32) {
    %c0_i32 = arith.constant 0 : i32
    %c0_i32_0 = arith.constant 0 : i32
    %c0_i32_1 = arith.constant 0 : i32
    return %c0_i32, %c0_i32_0 : i32, i32
  }
  func.func @transform_2(%arg0: i32) -> (i32, i32) {
    %c0_i32 = arith.constant 0 : i32
    %c0_i32_0 = arith.constant 0 : i32
    %c0_i32_1 = arith.constant 0 : i32
    return %c0_i32, %c0_i32_0 : i32, i32
  }
  func.func @transform_3(%arg0: i32) -> (i32, i32) {
    %c0_i32 = arith.constant 0 : i32
    %c0_i32_0 = arith.constant 0 : i32
    %c0_i32_1 = arith.constant 0 : i32
    return %c0_i32, %c0_i32_0 : i32, i32
  }
  func.func @transform_4(%arg0: i32) -> (i32, i32) {
    %c0_i32 = arith.constant 0 : i32
    %c0_i32_0 = arith.constant 0 : i32
    %c0_i32_1 = arith.constant 0 : i32
    return %c0_i32, %c0_i32_0 : i32, i32
  }
  func.func @transform_5(%arg0: i32) -> (i32, i32) {
    %c0_i32 = arith.constant 0 : i32
    %c0_i32_0 = arith.constant 0 : i32
    %c0_i32_1 = arith.constant 0 : i32
    return %c0_i32, %c0_i32_0 : i32, i32
  }
  func.func @transform_6(%arg0: i32) -> (i32, i32) {
    %c0_i32 = arith.constant 0 : i32
    %c0_i32_0 = arith.constant 0 : i32
    %c0_i32_1 = arith.constant 0 : i32
    return %c0_i32, %c0_i32_0 : i32, i32
  }
  func.func @transform_7(%arg0: i32) -> (i32, i32) {
    %c0_i32 = arith.constant 0 : i32
    %c0_i32_0 = arith.constant 0 : i32
    %c0_i32_1 = arith.constant 0 : i32
    return %c0_i32, %c0_i32_0 : i32, i32
  }
  func.func @transform_8(%arg0: i32) -> (i32, i32) {
    %c0_i32 = arith.constant 0 : i32
    %c0_i32_0 = arith.constant 0 : i32
    %c0_i32_1 = arith.constant 0 : i32
    return %c0_i32, %c0_i32_0 : i32, i32
  }
  func.func @transform_9(%arg0: i32) -> (i32, i32) {
    %c0_i32 = arith.constant 0 : i32
    %c0_i32_0 = arith.constant 0 : i32
    %c0_i32_1 = arith.constant 0 : i32
    return %c0_i32, %c0_i32_0 : i32, i32
  }
  func.func @transform_10(%arg0: i32) -> (i32, i32) {
    %c0_i32 = arith.constant 0 : i32
    %c0_i32_0 = arith.constant 0 : i32
    %c0_i32_1 = arith.constant 0 : i32
    return %c0_i32, %c0_i32_0 : i32, i32
  }
  func.func @transform_11(%arg0: i32) -> (i32, i32) {
    %c0_i32 = arith.constant 0 : i32
    %c0_i32_0 = arith.constant 0 : i32
    return %arg0, %c0_i32 : i32, i32
  }
}

</mosaic_0001>

<bundles_post_ra>
// kernel: lenet1dbn_forward.1
= control target key start
LH: loop header
LB: loop body
LE: loop exit
PB: predicated region body
PF: predicated region fallthrough
CT: control target
= control target key end

     0   :  { %v3364_v3 = vmov 0.0   ;;  %vm3365_vm0 = vmmov 0   ;;  %s3366_s25 = smov 12   ;;  %s3367_s26 = smov 4   ;;  %vm236_vm1 = vcmask 1041408   ;;  %vm214_vm2 = vcmask 31744   ;;  %s4579_s0 = inlined_call_operand.vmem [shape: f32[32,8,4], index: 0, kind: input, shape index: {}]   ;;  %s4580_s1 = inlined_call_operand.vmem [shape: f32[20,6], index: 1, kind: input, shape index: {}]   ;;  %s4581_s2 = inlined_call_operand.vmem [shape: f32[1,6], index: 2, kind: input, shape index: {}]   ;;  %s4582_s3 = inlined_call_operand.vmem [shape: f32[30,16], index: 3, kind: input, shape index: {}]   ;;  %s4583_s4 = inlined_call_operand.vmem [shape: f32[1,16], index: 4, kind: input, shape index: {}]   ;;  %s4584_s5 = inlined_call_operand.vmem [shape: f32[80,120], index: 5, kind: input, shape index: {}]   ;;  %s4585_s7 = inlined_call_operand.vmem [shape: f32[120,84], index: 7, kind: input, shape index: {}]   ;;  %s4586_s9 = inlined_call_operand.vmem [shape: f32[84,128], index: 9, kind: input, shape index: {}]   ;;  %s4587_s6 = inlined_call_operand.vmem [shape: f32[1,120], index: 6, kind: input, shape index: {}]   ;;  %s4588_s8 = inlined_call_operand.vmem [shape: f32[1,84], index: 8, kind: input, shape index: {}]   ;;  %s4589_s10 = inlined_call_operand.vmem [shape: f32[1,128], index: 10, kind: input, shape index: {}]   ;;  %s4590_s11 = inlined_call_operand.vmem [shape: f32[8,128], index: 11, kind: output, shape index: {}]  }
   0x1   :  { %v2787_v0 = vld [vmem:[%s4579_s0 + $0x18] sm:$0xff]  ;;  %v2785_v1 = vld [vmem:[%s4579_s0 + $0x8] sm:$0xff]  ;;  %v2788_v2 = vld [vmem:[%s4579_s0 + $0x20] sm:$0xff]  ;;  %2998 = vmatprep.subr.bf16.mxu1 %v3364_v3  ;;  %3014 = vmatprep.subr.bf16.mxu0 %v3364_v3  ;;  %s3368_s12 = smov 16   ;;  %s3369_s13 = smov 8   ;;  %vm218_vm3 = vcmask 64512  }
   0x2   :  { %v3447_v4 = vpack.c.bf16 %v2787_v0, %v2787_v0  ;;  %v3449_v5 = vpack.c.bf16 %v2785_v1, %v2785_v1  ;;  %v2786_v6 = vld [vmem:[%s4579_s0 + $0x10] sm:$0xff]  ;;  %3002 = vmatprep.mubr.msk.bf16.mxu1 %vm3365_vm0, %v3364_v3  ;;  %3018 = vmatprep.mubr.msk.bf16.mxu0 %vm3365_vm0, %v3364_v3  ;;  %v3462_v7 = vpack.c.bf16 %v2788_v2, %v2788_v2  ;;  %v39_v9 = vld [vmem:[%s4580_s1] sm:$0xff]  ;;  %v40_v10 = vld [vmem:[%s4580_s1 + $0x8] sm:$0xff]  ;;  %vm221_vm4 = vcmask 97280   ;;  %s3371_s15 = smov 18   ;;  %s3374_s29 = smov 48  }
   0x3   :  { %v3464_v8 = vpack.c.bf16 %v2786_v6, %v2786_v6  ;;  %v3476_v11 = vpack.c.bf16 %v40_v10, %v39_v9  ;;  %v41_v12 = vld [vmem:[%s4580_s1 + $0x10] sm:$0xf]  ;;  %v2789_v13 = vld [vmem:[%s4579_s0 + $0x28] sm:$0xff]  ;;  %v2791_v19 = vld [vmem:[%s4579_s0 + $0x38] sm:$0xff]  ;;  %vm224_vm5 = vcmask 130048   ;;  %vm233_vm6 = vcmask 162816  }
   0x4   :  { %209 = vrot.lane.b32.xlu1 %v3447_v4, %s3366_s25  ;;  %203 = vrot.lane.b32.xlu0 %v3449_v5, %s3367_s26  ;;  %v43_v14 = vpack.c.bf16 %v41_v12, %v41_v12  ;;  %v3495_v16 = vpack.c.bf16 %v2789_v13, %v2789_v13  ;;  %v2790_v17 = vld [vmem:[%s4579_s0 + $0x30] sm:$0xff]  ;;  %v3525_v20 = vpack.c.bf16 %v2791_v19, %v2791_v19  ;;  %v2792_v21 = vld [vmem:[%s4579_s0 + $0x40] sm:$0xff]  ;;  %vm1989_vm7 = vcmask 1046528   ;;  %s3375_s23 = smov 64  }
   0x5   :  { %2999 = vmatpush3.bf16.msra.mxu1 %v3476_v11  ;;  %3015 = vmatpush3.bf16.msra.mxu0 %v3476_v11  ;;  %v3516_v18 = vpack.c.bf16 %v2790_v17, %v2790_v17  ;;  %v3542_v22 = vpack.c.bf16 %v2792_v21, %v2792_v21  ;;  %v2793_v23 = vld [vmem:[%s4579_s0 + $0x48] sm:$0xff]  ;;  %v2794_v25 = vld [vmem:[%s4579_s0 + $0x50] sm:$0xff]  ;;  %v2795_v27 = vld [vmem:[%s4579_s0 + $0x58] sm:$0xff]  ;;  %vm1968_vm8 = vcmask 48128   ;;  %vm1974_vm9 = vcmask 146432  }
   0x6   :  { %3000 = vmatprep.subr.bf16.mxu1 %v3364_v3  ;;  %v3488_v15 = vsel %vm236_vm1, %v43_v14, 0  ;;  %3016 = vmatprep.subr.bf16.mxu0 %v3364_v3  ;;  %v3551_v24 = vpack.c.bf16 %v2793_v23, %v2793_v23  ;;  %v3568_v26 = vpack.c.bf16 %v2794_v25, %v2794_v25  ;;  %v3577_v28 = vpack.c.bf16 %v2795_v27, %v2795_v27  ;;  %v2796_v29 = vld [vmem:[%s4579_s0 + $0x60] sm:$0xff]  ;;  %v2797_v31 = vld [vmem:[%s4579_s0 + $0x68] sm:$0xff]  ;;  %v2798_v33 = vld [vmem:[%s4579_s0 + $0x70] sm:$0xff] }
   0x7   :  { %v3594_v30 = vpack.c.bf16 %v2796_v29, %v2796_v29  ;;  %v3603_v32 = vpack.c.bf16 %v2797_v31, %v2797_v31  ;;  %v3620_v34 = vpack.c.bf16 %v2798_v33, %v2798_v33  ;;  %v2799_v35 = vld [vmem:[%s4579_s0 + $0x78] sm:$0xff]  ;;  %v2800_v37 = vld [vmem:[%s4579_s0 + $0x80] sm:$0xff]  ;;  %v2801_v39 = vld [vmem:[%s4579_s0 + $0x88] sm:$0xff]  ;;  %vm1977_vm10 = vcmask 195584  }
   0x8   :  { %212 = vrot.lane.b32.xlu1 %v3462_v7, %s3368_s12  ;;  %206 = vrot.lane.b32.xlu0 %v3464_v8, %s3369_s13  ;;  %v3629_v36 = vpack.c.bf16 %v2799_v35, %v2799_v35  ;;  %v3646_v38 = vpack.c.bf16 %v2800_v37, %v2800_v37  ;;  %v3655_v40 = vpack.c.bf16 %v2801_v39, %v2801_v39  ;;  %v107_v41 = vld [vmem:[%s4579_s0] sm:$0xff]  ;;  %v2802_v42 = vld [vmem:[%s4579_s0 + $0x90] sm:$0xff]  ;;  %vm1986_vm11 = vcmask 244736  }
   0x9   :  { %3001 = vmatpush3.bf16.msra.mxu1 %v3488_v15  ;;  %3017 = vmatpush3.bf16.msra.mxu0 %v3488_v15  ;;  %v108_v45 = vpack.c.bf16 %v107_v41, %v107_v41  ;;  %v3675_v46 = vpack.c.bf16 %v2802_v42, %v2802_v42  ;;  %v2803_v47 = vld [vmem:[%s4579_s0 + $0x98] sm:$0xff]  ;;  %v2804_v63 = vld [vmem:[%s4579_s0 + $0xa0] sm:$0xff]  ;;  %v2806_v31 = vld [vmem:[%s4579_s0 + $0xb0] sm:$0xff]  ;;  %vm2608_vm12 = vcmask 261120   ;;  %vm2611_vm13 = vcmask 392192  }
   0xa   :  { %3006 = vmatprep.subr.bf16.mxu1 %v3364_v3  ;;  %3030 = vmatprep.subr.bf16.mxu0 %v3364_v3  ;;  %v3687_v53 = vpack.c.bf16 %v2803_v47, %v2803_v47  ;;  %v3721_v2 = vpack.c.bf16 %v2804_v63, %v2804_v63  ;;  %v3766_v37 = vpack.c.bf16 %v2806_v31, %v2806_v31  ;;  %v2807_v39 = vld [vmem:[%s4579_s0 + $0xb8] sm:$0xff]  ;;  %vm2614_vm14 = vcmask 523264  }
   0xb   :  { %vm2624_vm15 = vcmask 654336  }
   0xc   :  { %283 = vrot.lane.b32.xlu1 %v3447_v4, %s3369_s13  ;;  %281 = vrot.lane.b32.xlu0 %v3464_v8, %s3367_s26 }
  0x10   :  { %288 = vrot.lane.b32.xlu1 %v3495_v16, %s3368_s12  ;;  %285 = vrot.lane.b32.xlu0 %v3462_v7, %s3366_s25 }
  0x14   :  { %403 = vrot.lane.b32.xlu1 %v3462_v7, %s3367_s26  ;;  %342 = vrot.lane.b32.xlu0 %v3447_v4, %s3367_s26 }
  0x18   :  { %405 = vrot.lane.b32.xlu1 %v3495_v16, %s3369_s13  ;;  %344 = vrot.lane.b32.xlu0 %v3462_v7, %s3369_s13 }
  0x1c   :  { %407 = vrot.lane.b32.xlu1 %v3516_v18, %s3366_s25  ;;  %346 = vrot.lane.b32.xlu0 %v3495_v16, %s3366_s25 }
  0x20   :  { %410 = vrot.lane.b32.xlu1 %v3525_v20, %s3368_s12  ;;  %349 = vrot.lane.b32.xlu0 %v3516_v18, %s3368_s12 }
  0x24   :  { %525 = vrot.lane.b32.xlu1 %v3516_v18, %s3367_s26  ;;  %464 = vrot.lane.b32.xlu0 %v3495_v16, %s3367_s26 }
  0x28   :  { %527 = vrot.lane.b32.xlu1 %v3525_v20, %s3369_s13  ;;  %466 = vrot.lane.b32.xlu0 %v3516_v18, %s3369_s13 }
  0x2c   :  { %529 = vrot.lane.b32.xlu1 %v3542_v22, %s3366_s25  ;;  %468 = vrot.lane.b32.xlu0 %v3525_v20, %s3366_s25 }
  0x30   :  { %532 = vrot.lane.b32.xlu1 %v3551_v24, %s3368_s12  ;;  %471 = vrot.lane.b32.xlu0 %v3542_v22, %s3368_s12 }
  0x34   :  { %647 = vrot.lane.b32.xlu1 %v3542_v22, %s3367_s26  ;;  %586 = vrot.lane.b32.xlu0 %v3525_v20, %s3367_s26 }
  0x38   :  { %649 = vrot.lane.b32.xlu1 %v3551_v24, %s3369_s13  ;;  %588 = vrot.lane.b32.xlu0 %v3542_v22, %s3369_s13 }
  0x3c   :  { %651 = vrot.lane.b32.xlu1 %v3568_v26, %s3366_s25  ;;  %590 = vrot.lane.b32.xlu0 %v3551_v24, %s3366_s25 }
  0x40   :  { %654 = vrot.lane.b32.xlu1 %v3577_v28, %s3368_s12  ;;  %593 = vrot.lane.b32.xlu0 %v3568_v26, %s3368_s12 }
  0x44   :  { %769 = vrot.lane.b32.xlu1 %v3568_v26, %s3367_s26  ;;  %708 = vrot.lane.b32.xlu0 %v3551_v24, %s3367_s26 }
  0x48   :  { %771 = vrot.lane.b32.xlu1 %v3577_v28, %s3369_s13  ;;  %710 = vrot.lane.b32.xlu0 %v3568_v26, %s3369_s13 }
  0x4c   :  { %773 = vrot.lane.b32.xlu1 %v3594_v30, %s3366_s25  ;;  %712 = vrot.lane.b32.xlu0 %v3577_v28, %s3366_s25 }
  0x50   :  { %776 = vrot.lane.b32.xlu1 %v3603_v32, %s3368_s12  ;;  %715 = vrot.lane.b32.xlu0 %v3594_v30, %s3368_s12 }
  0x54   :  { %891 = vrot.lane.b32.xlu1 %v3594_v30, %s3367_s26  ;;  %830 = vrot.lane.b32.xlu0 %v3577_v28, %s3367_s26 }
  0x58   :  { %893 = vrot.lane.b32.xlu1 %v3603_v32, %s3369_s13  ;;  %832 = vrot.lane.b32.xlu0 %v3594_v30, %s3369_s13 }
  0x5c   :  { %895 = vrot.lane.b32.xlu1 %v3620_v34, %s3366_s25  ;;  %834 = vrot.lane.b32.xlu0 %v3603_v32, %s3366_s25 }
  0x60   :  { %898 = vrot.lane.b32.xlu1 %v3629_v36, %s3368_s12  ;;  %837 = vrot.lane.b32.xlu0 %v3620_v34, %s3368_s12 }
  0x64   :  { %1013 = vrot.lane.b32.xlu1 %v3620_v34, %s3367_s26  ;;  %952 = vrot.lane.b32.xlu0 %v3603_v32, %s3367_s26 }
  0x68   :  { %1015 = vrot.lane.b32.xlu1 %v3629_v36, %s3369_s13  ;;  %954 = vrot.lane.b32.xlu0 %v3620_v34, %s3369_s13 }
  0x6c   :  { %1017 = vrot.lane.b32.xlu1 %v3646_v38, %s3366_s25  ;;  %956 = vrot.lane.b32.xlu0 %v3629_v36, %s3366_s25 }
  0x70   :  { %1020 = vrot.lane.b32.xlu1 %v3655_v40, %s3368_s12  ;;  %959 = vrot.lane.b32.xlu0 %v3646_v38, %s3368_s12 }
  0x74   :  { %1135 = vrot.lane.b32.xlu1 %v3646_v38, %s3367_s26  ;;  %1074 = vrot.lane.b32.xlu0 %v3629_v36, %s3367_s26 }
  0x76   :  { %v210_v43 = vpop.permute.xlu1 %209  ;;  %v204_v44 = vpop.permute.xlu0 %203 }
  0x77   :  { %v217_v48 = vsel %vm214_vm2, %v108_v45, %v204_v44 }
  0x78   :  { %1137 = vrot.lane.b32.xlu1 %v3655_v40, %s3369_s13  ;;  %1076 = vrot.lane.b32.xlu0 %v3646_v38, %s3369_s13 }
  0x7a   :  { %v213_v49 = vpop.permute.xlu1 %212  ;;  %v207_v50 = vpop.permute.xlu0 %206 }
  0x7b   :  { %v220_v51 = vsel %vm218_vm3, %v217_v48, %v207_v50 }
  0x7c   :  { %v223_v52 = vsel %vm221_vm4, %v220_v51, %v210_v43  ;;  %1139 = vrot.lane.b32.xlu1 %v3675_v46, %s3366_s25  ;;  %1078 = vrot.lane.b32.xlu0 %v3655_v40, %s3366_s25  ;;  %v3783_v43 = vpack.c.bf16 %v2807_v39, %v2807_v39 }
  0x7d   :  { %v226_v54 = vsel %vm224_vm5, %v223_v52, %v213_v49 }
  0x7e   :  { %v284_v55 = vpop.permute.xlu1 %283  ;;  %v282_v56 = vpop.permute.xlu0 %281  ;;  %3003 = vmatmul.mubr.msk.bf16.vlgmr.msra.gmra.mrb[0].mxu1 %vm233_vm6, %v226_v54 }
  0x7f   :  { %v292_v57 = vsel %vm214_vm2, %v3449_v5, %v282_v56  ;;  %3007 = vmatpush3.bf16.msra.mxu1 %v3476_v11  ;;  %3010 = vmatprep.mubr.msk.bf16.mxu1 %vm3365_vm0, %v3364_v3  ;;  %v2805_v5 = vld [vmem:[%s4579_s0 + $0xa8] sm:$0xff]  ;;  %v2808_v56 = vld [vmem:[%s4579_s0 + $0xc0] sm:$0xff] }
  0x80   :  { %1142 = vrot.lane.b32.xlu1 %v3687_v53, %s3368_s12  ;;  %1081 = vrot.lane.b32.xlu0 %v3675_v46, %s3368_s12  ;;  %v294_v59 = vsel %vm218_vm3, %v292_v57, %v284_v55  ;;  %v3732_v10 = vpack.c.bf16 %v2805_v5, %v2805_v5 }
  0x81   :  { %3008 = vmatprep.subr.bf16.mxu1 %v3364_v3 }
  0x82   :  { %v289_v58 = vpop.permute.xlu1 %288  ;;  %v286_v60 = vpop.permute.xlu0 %285 }
  0x83   :  { %v296_v61 = vsel %vm221_vm4, %v294_v59, %v286_v60  ;;  %3009 = vmatpush3.bf16.msra.mxu1 %v3488_v15  ;;  %v3816_v59 = vpack.c.bf16 %v2808_v56, %v2808_v56  ;;  %v2809_v60 = vld [vmem:[%s4579_s0 + $0xc8] sm:$0xff] }
  0x84   :  { %v298_v62 = vsel %vm224_vm5, %v296_v61, %v289_v58  ;;  %1257 = vrot.lane.b32.xlu1 %v3675_v46, %s3367_s26  ;;  %1196 = vrot.lane.b32.xlu0 %v3655_v40, %s3367_s26  ;;  %v3833_v63 = vpack.c.bf16 %v2809_v60, %v2809_v60 }
  0x85   :  { %3022 = vmatprep.subr.bf16.mxu1 %v3364_v3 }
  0x86   :  { %v404_v0 = vpop.permute.xlu1 %403  ;;  %v343_v1 = vpop.permute.xlu0 %342  ;;  %3011 = vmatmul.mubr.msk.bf16.vlgmr.msra.gmra.mrb[4].mxu1 %vm233_vm6, %v298_v62 }
  0x87   :  { %3023 = vmatpush3.bf16.msra.mxu1 %v3476_v11  ;;  %3026 = vmatprep.mubr.msk.bf16.mxu1 %vm3365_vm0, %v3364_v3  ;;  %v414_v14 = vsel %vm214_vm2, %v3447_v4, %v404_v0  ;;  %v353_v17 = vsel %vm214_vm2, %v3464_v8, %v343_v1 }
  0x88   :  { %1259 = vrot.lane.b32.xlu1 %v3687_v53, %s3369_s13  ;;  %1198 = vrot.lane.b32.xlu0 %v3675_v46, %s3369_s13 }
  0x89   :  { %3024 = vmatprep.subr.bf16.mxu1 %v3364_v3 }
  0x8a   :  { %v406_v6 = vpop.permute.xlu1 %405  ;;  %v345_v9 = vpop.permute.xlu0 %344 }
  0x8b   :  { %3025 = vmatpush3.bf16.msra.mxu1 %v3488_v15  ;;  %v416_v19 = vsel %vm218_vm3, %v414_v14, %v406_v6  ;;  %v355_v21 = vsel %vm218_vm3, %v353_v17, %v345_v9 }
  0x8c   :  { %1261 = vrot.lane.b32.xlu1 %v3721_v2, %s3366_s25  ;;  %1200 = vrot.lane.b32.xlu0 %v3687_v53, %s3366_s25 }
  0x8d   :  { %3038 = vmatprep.subr.bf16.mxu1 %v3364_v3 }
  0x8e   :  { %v408_v12 = vpop.permute.xlu1 %407  ;;  %v347_v13 = vpop.permute.xlu0 %346 }
  0x8f   :  { %v418_v23 = vsel %vm221_vm4, %v416_v19, %v408_v12  ;;  %v357_v25 = vsel %vm221_vm4, %v355_v21, %v347_v13  ;;  %v2810_v21 = vld [vmem:[%s4579_s0 + $0xd0] sm:$0xff] }
  0x90   :  { %1264 = vrot.lane.b32.xlu1 %v3732_v10, %s3368_s12  ;;  %1203 = vrot.lane.b32.xlu0 %v3721_v2, %s3368_s12 }
  0x92   :  { %v411_v27 = vpop.permute.xlu1 %410  ;;  %v350_v29 = vpop.permute.xlu0 %349 }
  0x93   :  { %v420_v4 = vsel %vm224_vm5, %v418_v23, %v411_v27  ;;  %v359_v8 = vsel %vm224_vm5, %v357_v25, %v350_v29  ;;  %v3866_v27 = vpack.c.bf16 %v2810_v21, %v2810_v21  ;;  %v2811_v29 = vld [vmem:[%s4579_s0 + $0xd8] sm:$0xff] }
  0x94   :  { %1379 = vrot.lane.b32.xlu1 %v3721_v2, %s3367_s26  ;;  %1318 = vrot.lane.b32.xlu0 %v3687_v53, %s3367_s26  ;;  %v3883_v31 = vpack.c.bf16 %v2811_v29, %v2811_v29 }
  0x95   :  { %3019 = vmatmul.mubr.msk.bf16.vlgmr.msra.gmra.mrb[0].mxu0 %vm233_vm6, %v359_v8  ;;  %3027 = vmatmul.mubr.msk.bf16.vlgmr.msra.gmra.mrb[8].mxu1 %vm233_vm6, %v420_v4 }
  0x96   :  { %v526_v33 = vpop.permute.xlu1 %525  ;;  %v465_v35 = vpop.permute.xlu0 %464  ;;  %3031 = vmatpush3.bf16.msra.mxu0 %v3476_v11  ;;  %3039 = vmatpush3.bf16.msra.mxu1 %v3476_v11 }
  0x97   :  { %3032 = vmatprep.subr.bf16.mxu0 %v3364_v3  ;;  %3040 = vmatprep.subr.bf16.mxu1 %v3364_v3  ;;  %v536_v47 = vsel %vm214_vm2, %v3495_v16, %v526_v33  ;;  %v475_v48 = vsel %vm214_vm2, %v3462_v7, %v465_v35 }
  0x98   :  { %1381 = vrot.lane.b32.xlu1 %v3732_v10, %s3369_s13  ;;  %1320 = vrot.lane.b32.xlu0 %v3721_v2, %s3369_s13 }
  0x99   :  { %3034 = vmatprep.mubr.msk.bf16.mxu0 %vm3365_vm0, %v3364_v3  ;;  %3042 = vmatprep.mubr.msk.bf16.mxu1 %vm3365_vm0, %v3364_v3 }
  0x9a   :  { %v528_v41 = vpop.permute.xlu1 %527  ;;  %v467_v42 = vpop.permute.xlu0 %466  ;;  %3033 = vmatpush3.bf16.msra.mxu0 %v3488_v15  ;;  %3041 = vmatpush3.bf16.msra.mxu1 %v3488_v15 }
  0x9b   :  { %3046 = vmatprep.subr.bf16.mxu0 %v3364_v3  ;;  %3054 = vmatprep.subr.bf16.mxu1 %v3364_v3  ;;  %v538_v49 = vsel %vm218_vm3, %v536_v47, %v528_v41  ;;  %v477_v50 = vsel %vm218_vm3, %v475_v48, %v467_v42 }
  0x9c   :  { %1383 = vrot.lane.b32.xlu1 %v3766_v37, %s3366_s25  ;;  %1322 = vrot.lane.b32.xlu0 %v3732_v10, %s3366_s25 }
  0x9e   :  { %v530_v44 = vpop.permute.xlu1 %529  ;;  %v469_v45 = vpop.permute.xlu0 %468 }
  0x9f   :  { %v540_v51 = vsel %vm221_vm4, %v538_v49, %v530_v44  ;;  %v479_v52 = vsel %vm221_vm4, %v477_v50, %v469_v45  ;;  %v2812_v50 = vld [vmem:[%s4579_s0 + $0xe0] sm:$0xff] }
  0xa0   :  { %1386 = vrot.lane.b32.xlu1 %v3783_v43, %s3368_s12  ;;  %1325 = vrot.lane.b32.xlu0 %v3766_v37, %s3368_s12 }
  0xa2   :  { %v533_v54 = vpop.permute.xlu1 %532  ;;  %v472_v55 = vpop.permute.xlu0 %471 }
  0xa3   :  { %v542_v16 = vsel %vm224_vm5, %v540_v51, %v533_v54  ;;  %v481_v7 = vsel %vm224_vm5, %v479_v52, %v472_v55  ;;  %v192_v54 = vpack.c.bf16 %v2812_v50, %v2812_v50  ;;  %v2813_v55 = vld [vmem:[%s4579_s0 + $0xe8] sm:$0xff] }
  0xa4   :  { %1501 = vrot.lane.b32.xlu1 %v3766_v37, %s3367_s26  ;;  %1440 = vrot.lane.b32.xlu0 %v3732_v10, %s3367_s26  ;;  %v195_v56 = vpack.c.bf16 %v2813_v55, %v2813_v55 }
  0xa5   :  { %3035 = vmatmul.mubr.msk.bf16.vlgmr.msra.gmra.mrb[4].mxu0 %vm233_vm6, %v481_v7  ;;  %3043 = vmatmul.mubr.msk.bf16.vlgmr.msra.gmra.mrb[12].mxu1 %vm233_vm6, %v542_v16 }
  0xa6   :  { %v648_v57 = vpop.permute.xlu1 %647  ;;  %v587_v58 = vpop.permute.xlu0 %586  ;;  %3047 = vmatpush3.bf16.msra.mxu0 %v3476_v11  ;;  %3055 = vmatpush3.bf16.msra.mxu1 %v3476_v11 }
  0xa7   :  { %3048 = vmatprep.subr.bf16.mxu0 %v3364_v3  ;;  %3056 = vmatprep.subr.bf16.mxu1 %v3364_v3  ;;  %v658_v5 = vsel %vm214_vm2, %v3525_v20, %v648_v57  ;;  %v597_v6 = vsel %vm214_vm2, %v3516_v18, %v587_v58 }
  0xa8   :  { %1503 = vrot.lane.b32.xlu1 %v3783_v43, %s3369_s13  ;;  %1442 = vrot.lane.b32.xlu0 %v3766_v37, %s3369_s13 }
  0xa9   :  { %3050 = vmatprep.mubr.msk.bf16.mxu0 %vm3365_vm0, %v3364_v3  ;;  %3058 = vmatprep.mubr.msk.bf16.mxu1 %vm3365_vm0, %v3364_v3 }
  0xaa   :  { %v650_v61 = vpop.permute.xlu1 %649  ;;  %v589_v62 = vpop.permute.xlu0 %588  ;;  %3049 = vmatpush3.bf16.msra.mxu0 %v3488_v15  ;;  %3057 = vmatpush3.bf16.msra.mxu1 %v3488_v15 }
  0xab   :  { %3062 = vmatprep.subr.bf16.mxu0 %v3364_v3  ;;  %3070 = vmatprep.subr.bf16.mxu1 %v3364_v3  ;;  %v660_v9 = vsel %vm218_vm3, %v658_v5, %v650_v61  ;;  %v599_v12 = vsel %vm218_vm3, %v597_v6, %v589_v62 }
  0xac   :  { %1505 = vrot.lane.b32.xlu1 %v3816_v59, %s3366_s25  ;;  %1444 = vrot.lane.b32.xlu0 %v3783_v43, %s3366_s25 }
  0xae   :  { %v652_v0 = vpop.permute.xlu1 %651  ;;  %v591_v1 = vpop.permute.xlu0 %590 }
  0xaf   :  { %v662_v13 = vsel %vm221_vm4, %v660_v9, %v652_v0  ;;  %v601_v14 = vsel %vm221_vm4, %v599_v12, %v591_v1 }
  0xb0   :  { %1508 = vrot.lane.b32.xlu1 %v3833_v63, %s3368_s12  ;;  %1447 = vrot.lane.b32.xlu0 %v3816_v59, %s3368_s12 }
  0xb2   :  { %v655_v17 = vpop.permute.xlu1 %654  ;;  %v594_v19 = vpop.permute.xlu0 %593 }
  0xb3   :  { %v664_v20 = vsel %vm224_vm5, %v662_v13, %v655_v17  ;;  %v603_v18 = vsel %vm224_vm5, %v601_v14, %v594_v19  ;;  %v2815_v19 = vld [vmem:[%s4579_s0 + $0xf8] sm:$0xff] }
  0xb4   :  { %1623 = vrot.lane.b32.xlu1 %v3816_v59, %s3367_s26  ;;  %1562 = vrot.lane.b32.xlu0 %v3783_v43, %s3367_s26  ;;  %v201_v21 = vpack.c.bf16 %v2815_v19, %v2815_v19 }
  0xb5   :  { %3051 = vmatmul.mubr.msk.bf16.vlgmr.msra.gmra.mrb[8].mxu0 %vm233_vm6, %v603_v18  ;;  %3059 = vmatmul.mubr.msk.bf16.vlgmr.msra.gmra.mrb[16].mxu1 %vm233_vm6, %v664_v20 }
  0xb6   :  { %v770_v23 = vpop.permute.xlu1 %769  ;;  %v709_v25 = vpop.permute.xlu0 %708  ;;  %3063 = vmatpush3.bf16.msra.mxu0 %v3476_v11  ;;  %3071 = vmatpush3.bf16.msra.mxu1 %v3476_v11 }
  0xb7   :  { %3064 = vmatprep.subr.bf16.mxu0 %v3364_v3  ;;  %3072 = vmatprep.subr.bf16.mxu1 %v3364_v3  ;;  %v780_v39 = vsel %vm214_vm2, %v3551_v24, %v770_v23  ;;  %v719_v41 = vsel %vm214_vm2, %v3542_v22, %v709_v25 }
  0xb8   :  { %1625 = vrot.lane.b32.xlu1 %v3833_v63, %s3369_s13  ;;  %1564 = vrot.lane.b32.xlu0 %v3816_v59, %s3369_s13 }
  0xb9   :  { %3066 = vmatprep.mubr.msk.bf16.mxu0 %vm3365_vm0, %v3364_v3  ;;  %3074 = vmatprep.mubr.msk.bf16.mxu1 %vm3365_vm0, %v3364_v3 }
  0xba   :  { %v772_v4 = vpop.permute.xlu1 %771  ;;  %v711_v8 = vpop.permute.xlu0 %710  ;;  %3065 = vmatpush3.bf16.msra.mxu0 %v3488_v15  ;;  %3073 = vmatpush3.bf16.msra.mxu1 %v3488_v15 }
  0xbb   :  { %3078 = vmatprep.subr.bf16.mxu0 %v3364_v3  ;;  %3086 = vmatprep.subr.bf16.mxu1 %v3364_v3  ;;  %v782_v42 = vsel %vm218_vm3, %v780_v39, %v772_v4  ;;  %v721_v44 = vsel %vm218_vm3, %v719_v41, %v711_v8 }
  0xbc   :  { %1627 = vrot.lane.b32.xlu1 %v3866_v27, %s3366_s25  ;;  %1566 = vrot.lane.b32.xlu0 %v3833_v63, %s3366_s25 }
  0xbe   :  { %v774_v33 = vpop.permute.xlu1 %773  ;;  %v713_v35 = vpop.permute.xlu0 %712 }
  0xbf   :  { %v784_v45 = vsel %vm221_vm4, %v782_v42, %v774_v33  ;;  %v723_v47 = vsel %vm221_vm4, %v721_v44, %v713_v35 }
  0xc0   :  { %1630 = vrot.lane.b32.xlu1 %v3883_v31, %s3368_s12  ;;  %1569 = vrot.lane.b32.xlu0 %v3866_v27, %s3368_s12 }
  0xc2   :  { %v777_v48 = vpop.permute.xlu1 %776  ;;  %v716_v49 = vpop.permute.xlu0 %715 }
  0xc3   :  { %v786_v24 = vsel %vm224_vm5, %v784_v45, %v777_v48  ;;  %v725_v22 = vsel %vm224_vm5, %v723_v47, %v716_v49 }
  0xc4   :  { %1745 = vrot.lane.b32.xlu1 %v3866_v27, %s3367_s26  ;;  %1684 = vrot.lane.b32.xlu0 %v3833_v63, %s3367_s26 }
  0xc5   :  { %3067 = vmatmul.mubr.msk.bf16.vlgmr.msra.gmra.mrb[12].mxu0 %vm233_vm6, %v725_v22  ;;  %3075 = vmatmul.mubr.msk.bf16.vlgmr.msra.gmra.mrb[20].mxu1 %vm233_vm6, %v786_v24 }
  0xc6   :  { %v892_v51 = vpop.permute.xlu1 %891  ;;  %v831_v52 = vpop.permute.xlu0 %830  ;;  %3079 = vmatpush3.bf16.msra.mxu0 %v3476_v11  ;;  %3087 = vmatpush3.bf16.msra.mxu1 %v3476_v11 }
  0xc7   :  { %3080 = vmatprep.subr.bf16.mxu0 %v3364_v3  ;;  %3088 = vmatprep.subr.bf16.mxu1 %v3364_v3  ;;  %v902_v60 = vsel %vm214_vm2, %v3577_v28, %v892_v51  ;;  %v841_v61 = vsel %vm214_vm2, %v3568_v26, %v831_v52  ;;  %v2814_v26 = vld [vmem:[%s4579_s0 + $0xf0] sm:$0xff] }
  0xc8   :  { %1747 = vrot.lane.b32.xlu1 %v3883_v31, %s3369_s13  ;;  %1686 = vrot.lane.b32.xlu0 %v3866_v27, %s3369_s13  ;;  %v198_v17 = vpack.c.bf16 %v2814_v26, %v2814_v26 }
  0xc9   :  { %3082 = vmatprep.mubr.msk.bf16.mxu0 %vm3365_vm0, %v3364_v3  ;;  %3090 = vmatprep.mubr.msk.bf16.mxu1 %vm3365_vm0, %v3364_v3 }
  0xca   :  { %v894_v16 = vpop.permute.xlu1 %893  ;;  %v833_v7 = vpop.permute.xlu0 %832  ;;  %3081 = vmatpush3.bf16.msra.mxu0 %v3488_v15  ;;  %3089 = vmatpush3.bf16.msra.mxu1 %v3488_v15 }
  0xcb   :  { %3094 = vmatprep.subr.bf16.mxu0 %v3364_v3  ;;  %3102 = vmatprep.subr.bf16.mxu1 %v3364_v3  ;;  %v904_v62 = vsel %vm218_vm3, %v902_v60, %v894_v16  ;;  %v843_v0 = vsel %vm218_vm3, %v841_v61, %v833_v7 }
  0xcc   :  { %1749 = vrot.lane.b32.xlu1 %v192_v54, %s3366_s25  ;;  %1688 = vrot.lane.b32.xlu0 %v3883_v31, %s3366_s25 }
  0xce   :  { %v896_v57 = vpop.permute.xlu1 %895  ;;  %v835_v58 = vpop.permute.xlu0 %834 }
  0xcf   :  { %v906_v1 = vsel %vm221_vm4, %v904_v62, %v896_v57  ;;  %v845_v5 = vsel %vm221_vm4, %v843_v0, %v835_v58 }
  0xd0   :  { %1752 = vrot.lane.b32.xlu1 %v195_v56, %s3368_s12  ;;  %1691 = vrot.lane.b32.xlu0 %v192_v54, %s3368_s12 }
  0xd2   :  { %v899_v6 = vpop.permute.xlu1 %898  ;;  %v838_v9 = vpop.permute.xlu0 %837 }
  0xd3   :  { %v908_v12 = vsel %vm224_vm5, %v906_v1, %v899_v6  ;;  %v847_v28 = vsel %vm224_vm5, %v845_v5, %v838_v9 }
  0xd4   :  { %1867 = vrot.lane.b32.xlu1 %v192_v54, %s3367_s26  ;;  %1806 = vrot.lane.b32.xlu0 %v3883_v31, %s3367_s26 }
  0xd5   :  { %3083 = vmatmul.mubr.msk.bf16.vlgmr.msra.gmra.mrb[16].mxu0 %vm233_vm6, %v847_v28  ;;  %3091 = vmatmul.mubr.msk.bf16.vlgmr.msra.gmra.mrb[24].mxu1 %vm233_vm6, %v908_v12 }
  0xd6   :  { %v1014_v13 = vpop.permute.xlu1 %1013  ;;  %v953_v14 = vpop.permute.xlu0 %952  ;;  %3095 = vmatpush3.bf16.msra.mxu0 %v3476_v11  ;;  %3103 = vmatpush3.bf16.msra.mxu1 %v3476_v11 }
  0xd7   :  { %3096 = vmatprep.subr.bf16.mxu0 %v3364_v3  ;;  %3104 = vmatprep.subr.bf16.mxu1 %v3364_v3  ;;  %v1024_v29 = vsel %vm214_vm2, %v3603_v32, %v1014_v13  ;;  %v963_v4 = vsel %vm214_vm2, %v3594_v30, %v953_v14 }
  0xd8   :  { %1869 = vrot.lane.b32.xlu1 %v195_v56, %s3369_s13  ;;  %1808 = vrot.lane.b32.xlu0 %v192_v54, %s3369_s13 }
  0xd9   :  { %3098 = vmatprep.mubr.msk.bf16.mxu0 %vm3365_vm0, %v3364_v3  ;;  %3106 = vmatprep.mubr.msk.bf16.mxu1 %vm3365_vm0, %v3364_v3 }
  0xda   :  { %v1016_v20 = vpop.permute.xlu1 %1015  ;;  %v955_v18 = vpop.permute.xlu0 %954  ;;  %3097 = vmatpush3.bf16.msra.mxu0 %v3488_v15  ;;  %3105 = vmatpush3.bf16.msra.mxu1 %v3488_v15 }
  0xdb   :  { %3110 = vmatprep.subr.bf16.mxu0 %v3364_v3  ;;  %3118 = vmatprep.subr.bf16.mxu1 %v3364_v3  ;;  %v1026_v8 = vsel %vm218_vm3, %v1024_v29, %v1016_v20  ;;  %v965_v33 = vsel %vm218_vm3, %v963_v4, %v955_v18 }
  0xdc   :  { %1871 = vrot.lane.b32.xlu1 %v198_v17, %s3366_s25  ;;  %1810 = vrot.lane.b32.xlu0 %v195_v56, %s3366_s25 }
  0xde   :  { %v1018_v23 = vpop.permute.xlu1 %1017  ;;  %v957_v25 = vpop.permute.xlu0 %956 }
  0xdf   :  { %v1028_v35 = vsel %vm221_vm4, %v1026_v8, %v1018_v23  ;;  %v967_v39 = vsel %vm221_vm4, %v965_v33, %v957_v25 }
  0xe0   :  { %1874 = vrot.lane.b32.xlu1 %v201_v21, %s3368_s12  ;;  %1813 = vrot.lane.b32.xlu0 %v198_v17, %s3368_s12 }
  0xe2   :  { %v1021_v41 = vpop.permute.xlu1 %1020  ;;  %v960_v42 = vpop.permute.xlu0 %959 }
  0xe3   :  { %v1030_v44 = vsel %vm224_vm5, %v1028_v35, %v1021_v41  ;;  %v969_v32 = vsel %vm224_vm5, %v967_v39, %v960_v42 }
  0xe4   :  { %3099 = vmatmul.mubr.msk.bf16.vlgmr.msra.gmra.mrb[20].mxu0 %vm233_vm6, %v969_v32  ;;  %3107 = vmatmul.mubr.msk.bf16.vlgmr.msra.gmra.mrb[28].mxu1 %vm233_vm6, %v1030_v44 }
  0xe5   :  { %3111 = vmatpush3.bf16.msra.mxu0 %v3476_v11  ;;  %3119 = vmatpush3.bf16.msra.mxu1 %v3476_v11 }
  0xe6   :  { %v1136_v30 = vpop.permute.xlu1 %1135  ;;  %v1075_v45 = vpop.permute.xlu0 %1074  ;;  %3112 = vmatprep.subr.bf16.mxu0 %v3364_v3  ;;  %3120 = vmatprep.subr.bf16.mxu1 %v3364_v3 }
  0xe7   :  { %3114 = vmatprep.mubr.msk.bf16.mxu0 %vm3365_vm0, %v3364_v3  ;;  %3122 = vmatprep.mubr.msk.bf16.mxu1 %vm3365_vm0, %v3364_v3  ;;  %v1146_v22 = vsel %vm214_vm2, %v3629_v36, %v1136_v30  ;;  %v1085_v50 = vsel %vm214_vm2, %v3620_v34, %v1075_v45 }
  0xe9   :  { %3113 = vmatpush3.bf16.msra.mxu0 %v3488_v15  ;;  %3121 = vmatpush3.bf16.msra.mxu1 %v3488_v15 }
  0xea   :  { %v1138_v47 = vpop.permute.xlu1 %1137  ;;  %v1077_v48 = vpop.permute.xlu0 %1076  ;;  %3126 = vmatprep.subr.bf16.mxu0 %v3364_v3  ;;  %3134 = vmatprep.subr.bf16.mxu1 %v3364_v3 }
  0xeb   :  { %v1148_v51 = vsel %vm218_vm3, %v1146_v22, %v1138_v47  ;;  %v1087_v52 = vsel %vm218_vm3, %v1085_v50, %v1077_v48 }
  0xee   :  { %v1140_v49 = vpop.permute.xlu1 %1139  ;;  %v1079_v24 = vpop.permute.xlu0 %1078 }
  0xef   :  { %v1150_v54 = vsel %vm221_vm4, %v1148_v51, %v1140_v49  ;;  %v1089_v55 = vsel %vm221_vm4, %v1087_v52, %v1079_v24 }
  0xf2   :  { %v1143_v16 = vpop.permute.xlu1 %1142  ;;  %v1082_v7 = vpop.permute.xlu0 %1081 }
  0xf3   :  { %v1152_v56 = vsel %vm224_vm5, %v1150_v54, %v1143_v16  ;;  %v1091_v57 = vsel %vm224_vm5, %v1089_v55, %v1082_v7 }
  0xf4   :  { %3115 = vmatmul.mubr.msk.bf16.vlgmr.msra.gmra.mrb[24].mxu0 %vm233_vm6, %v1091_v57  ;;  %3123 = vmatmul.mubr.msk.bf16.vlgmr.msra.gmra.mrb[32].mxu1 %vm233_vm6, %v1152_v56 }
  0xf5   :  { %3127 = vmatpush3.bf16.msra.mxu0 %v3476_v11  ;;  %3135 = vmatpush3.bf16.msra.mxu1 %v3476_v11 }
  0xf6   :  { %v1258_v34 = vpop.permute.xlu1 %1257  ;;  %v1197_v36 = vpop.permute.xlu0 %1196  ;;  %3128 = vmatprep.subr.bf16.mxu0 %v3364_v3  ;;  %3136 = vmatprep.subr.bf16.mxu1 %v3364_v3 }
  0xf7   :  { %3130 = vmatprep.mubr.msk.bf16.mxu0 %vm3365_vm0, %v3364_v3  ;;  %3138 = vmatprep.mubr.msk.bf16.mxu1 %vm3365_vm0, %v3364_v3  ;;  %v1268_v0 = vsel %vm214_vm2, %v3655_v40, %v1258_v34  ;;  %v1207_v1 = vsel %vm214_vm2, %v3646_v38, %v1197_v36 }
  0xf9   :  { %3129 = vmatpush3.bf16.msra.mxu0 %v3488_v15  ;;  %3137 = vmatpush3.bf16.msra.mxu1 %v3488_v15 }
  0xfa   :  { %v1260_v58 = vpop.permute.xlu1 %1259  ;;  %v1199_v60 = vpop.permute.xlu0 %1198  ;;  %3142 = vmatprep.subr.bf16.mxu0 %v3364_v3  ;;  %3150 = vmatprep.subr.bf16.mxu1 %v3364_v3 }
  0xfb   :  { %v1270_v5 = vsel %vm218_vm3, %v1268_v0, %v1260_v58  ;;  %v1209_v6 = vsel %vm218_vm3, %v1207_v1, %v1199_v60 }
  0xfe   :  { %v1262_v61 = vpop.permute.xlu1 %1261  ;;  %v1201_v62 = vpop.permute.xlu0 %1200 }
  0xff   :  { %v1272_v9 = vsel %vm221_vm4, %v1270_v5, %v1262_v61  ;;  %v1211_v12 = vsel %vm221_vm4, %v1209_v6, %v1201_v62 }
 0x102   :  { %v1265_v28 = vpop.permute.xlu1 %1264  ;;  %v1204_v26 = vpop.permute.xlu0 %1203 }
 0x103   :  { %v1274_v13 = vsel %vm224_vm5, %v1272_v9, %v1265_v28  ;;  %v1213_v14 = vsel %vm224_vm5, %v1211_v12, %v1204_v26 }
 0x104   :  { %3131 = vmatmul.mubr.msk.bf16.vlgmr.msra.gmra.mrb[28].mxu0 %vm233_vm6, %v1213_v14  ;;  %3139 = vmatmul.mubr.msk.bf16.vlgmr.msra.gmra.mrb[36].mxu1 %vm233_vm6, %v1274_v13 }
 0x105   :  { %3143 = vmatpush3.bf16.msra.mxu0 %v3476_v11  ;;  %3151 = vmatpush3.bf16.msra.mxu1 %v3476_v11 }
 0x106   :  { %v1380_v38 = vpop.permute.xlu1 %1379  ;;  %v1319_v40 = vpop.permute.xlu0 %1318  ;;  %3144 = vmatprep.subr.bf16.mxu0 %v3364_v3  ;;  %3152 = vmatprep.subr.bf16.mxu1 %v3364_v3 }
 0x107   :  { %3146 = vmatprep.mubr.msk.bf16.mxu0 %vm3365_vm0, %v3364_v3  ;;  %3154 = vmatprep.mubr.msk.bf16.mxu1 %vm3365_vm0, %v3364_v3  ;;  %v1390_v21 = vsel %vm214_vm2, %v3687_v53, %v1380_v38  ;;  %v1329_v23 = vsel %vm214_vm2, %v3675_v46, %v1319_v40 }
 0x109   :  { %3145 = vmatpush3.bf16.msra.mxu0 %v3488_v15  ;;  %3153 = vmatpush3.bf16.msra.mxu1 %v3488_v15 }
 0x10a   :  { %v1382_v17 = vpop.permute.xlu1 %1381  ;;  %v1321_v19 = vpop.permute.xlu0 %1320  ;;  %3158 = vmatprep.subr.bf16.mxu0 %v3364_v3  ;;  %3166 = vmatprep.subr.bf16.mxu1 %v3364_v3 }
 0x10b   :  { %v1392_v25 = vsel %vm218_vm3, %v1390_v21, %v1382_v17  ;;  %v1331_v29 = vsel %vm218_vm3, %v1329_v23, %v1321_v19 }
 0x10e   :  { %v1384_v20 = vpop.permute.xlu1 %1383  ;;  %v1323_v18 = vpop.permute.xlu0 %1322 }
 0x10f   :  { %v1394_v4 = vsel %vm221_vm4, %v1392_v25, %v1384_v20  ;;  %v1333_v8 = vsel %vm221_vm4, %v1331_v29, %v1323_v18 }
 0x112   :  { %v1387_v33 = vpop.permute.xlu1 %1386  ;;  %v1326_v35 = vpop.permute.xlu0 %1325 }
 0x113   :  { %v1396_v39 = vsel %vm224_vm5, %v1394_v4, %v1387_v33  ;;  %v1335_v41 = vsel %vm224_vm5, %v1333_v8, %v1326_v35 }
 0x114   :  { %3147 = vmatmul.mubr.msk.bf16.vlgmr.msra.gmra.mrb[32].mxu0 %vm233_vm6, %v1335_v41  ;;  %3155 = vmatmul.mubr.msk.bf16.vlgmr.msra.gmra.mrb[40].mxu1 %vm233_vm6, %v1396_v39 }
 0x115   :  { %3159 = vmatpush3.bf16.msra.mxu0 %v3476_v11  ;;  %3167 = vmatpush3.bf16.msra.mxu1 %v3476_v11 }
 0x116   :  { %v1502_v46 = vpop.permute.xlu1 %1501  ;;  %v1441_v53 = vpop.permute.xlu0 %1440  ;;  %3160 = vmatprep.subr.bf16.mxu0 %v3364_v3  ;;  %3168 = vmatprep.subr.bf16.mxu1 %v3364_v3 }
 0x117   :  { %3162 = vmatprep.mubr.msk.bf16.mxu0 %vm3365_vm0, %v3364_v3  ;;  %3170 = vmatprep.mubr.msk.bf16.mxu1 %vm3365_vm0, %v3364_v3  ;;  %v1512_v45 = vsel %vm214_vm2, %v3732_v10, %v1502_v46  ;;  %v1451_v47 = vsel %vm214_vm2, %v3721_v2, %v1441_v53 }
 0x119   :  { %3161 = vmatpush3.bf16.msra.mxu0 %v3488_v15  ;;  %3169 = vmatpush3.bf16.msra.mxu1 %v3488_v15 }
 0x11a   :  { %v1504_v42 = vpop.permute.xlu1 %1503  ;;  %v1443_v44 = vpop.permute.xlu0 %1442  ;;  %3174 = vmatprep.subr.bf16.mxu0 %v3364_v3  ;;  %3182 = vmatprep.subr.bf16.mxu1 %v3364_v3 }
 0x11b   :  { %v1514_v48 = vsel %vm218_vm3, %v1512_v45, %v1504_v42  ;;  %v1453_v49 = vsel %vm218_vm3, %v1451_v47, %v1443_v44 }
 0x11e   :  { %v1506_v32 = vpop.permute.xlu1 %1505  ;;  %v1445_v30 = vpop.permute.xlu0 %1444 }
 0x11f   :  { %v1516_v24 = vsel %vm221_vm4, %v1514_v48, %v1506_v32  ;;  %v1455_v22 = vsel %vm221_vm4, %v1453_v49, %v1445_v30 }
 0x122   :  { %v1509_v50 = vpop.permute.xlu1 %1508  ;;  %v1448_v51 = vpop.permute.xlu0 %1447 }
 0x123   :  { %v1518_v52 = vsel %vm224_vm5, %v1516_v24, %v1509_v50  ;;  %v1457_v54 = vsel %vm224_vm5, %v1455_v22, %v1448_v51 }
 0x124   :  { %3163 = vmatmul.mubr.msk.bf16.vlgmr.msra.gmra.mrb[36].mxu0 %vm233_vm6, %v1457_v54  ;;  %3171 = vmatmul.mubr.msk.bf16.vlgmr.msra.gmra.mrb[44].mxu1 %vm233_vm6, %v1518_v52 }
 0x125   :  { %3175 = vmatpush3.bf16.msra.mxu0 %v3476_v11  ;;  %3183 = vmatpush3.bf16.msra.mxu1 %v3476_v11 }
 0x126   :  { %v1624_v2 = vpop.permute.xlu1 %1623  ;;  %v1563_v10 = vpop.permute.xlu0 %1562  ;;  %3176 = vmatprep.subr.bf16.mxu0 %v3364_v3  ;;  %3184 = vmatprep.subr.bf16.mxu1 %v3364_v3 }
 0x127   :  { %3178 = vmatprep.mubr.msk.bf16.mxu0 %vm3365_vm0, %v3364_v3  ;;  %3186 = vmatprep.mubr.msk.bf16.mxu1 %vm3365_vm0, %v3364_v3  ;;  %v1634_v57 = vsel %vm214_vm2, %v3783_v43, %v1624_v2  ;;  %v1573_v34 = vsel %vm214_vm2, %v3766_v37, %v1563_v10 }
 0x129   :  { %3177 = vmatpush3.bf16.msra.mxu0 %v3488_v15  ;;  %3185 = vmatpush3.bf16.msra.mxu1 %v3488_v15 }
 0x12a   :  { %v1626_v55 = vpop.permute.xlu1 %1625  ;;  %v1565_v16 = vpop.permute.xlu0 %1564  ;;  %3190 = vmatprep.subr.bf16.mxu0 %v3364_v3  ;;  %3198 = vmatprep.subr.bf16.mxu1 %v3364_v3 }
 0x12b   :  { %v1636_v36 = vsel %vm218_vm3, %v1634_v57, %v1626_v55  ;;  %v1575_v58 = vsel %vm218_vm3, %v1573_v34, %v1565_v16 }
 0x12e   :  { %v1628_v7 = vpop.permute.xlu1 %1627  ;;  %v1567_v56 = vpop.permute.xlu0 %1566 }
 0x12f   :  { %v1638_v60 = vsel %vm221_vm4, %v1636_v36, %v1628_v7  ;;  %v1577_v61 = vsel %vm221_vm4, %v1575_v58, %v1567_v56 }
 0x132   :  { %v1631_v62 = vpop.permute.xlu1 %1630  ;;  %v1570_v0 = vpop.permute.xlu0 %1569 }
 0x133   :  { %v1640_v1 = vsel %vm224_vm5, %v1638_v60, %v1631_v62  ;;  %v1579_v5 = vsel %vm224_vm5, %v1577_v61, %v1570_v0 }
 0x134   :  { %3179 = vmatmul.mubr.msk.bf16.vlgmr.msra.gmra.mrb[40].mxu0 %vm233_vm6, %v1579_v5  ;;  %3187 = vmatmul.mubr.msk.bf16.vlgmr.msra.gmra.mrb[48].mxu1 %vm233_vm6, %v1640_v1 }
 0x135   :  { %3191 = vmatpush3.bf16.msra.mxu0 %v3476_v11  ;;  %3199 = vmatpush3.bf16.msra.mxu1 %v3476_v11 }
 0x136   :  { %v1746_v37 = vpop.permute.xlu1 %1745  ;;  %v1685_v43 = vpop.permute.xlu0 %1684  ;;  %3192 = vmatprep.subr.bf16.mxu0 %v3364_v3  ;;  %3200 = vmatprep.subr.bf16.mxu1 %v3364_v3 }
 0x137   :  { %3194 = vmatprep.mubr.msk.bf16.mxu0 %vm3365_vm0, %v3364_v3  ;;  %3202 = vmatprep.mubr.msk.bf16.mxu1 %vm3365_vm0, %v3364_v3  ;;  %v1756_v26 = vsel %vm214_vm2, %v3833_v63, %v1746_v37  ;;  %v1695_v13 = vsel %vm214_vm2, %v3816_v59, %v1685_v43 }
 0x139   :  { %3193 = vmatpush3.bf16.msra.mxu0 %v3488_v15  ;;  %3201 = vmatpush3.bf16.msra.mxu1 %v3488_v15 }
 0x13a   :  { %v1748_v6 = vpop.permute.xlu1 %1747  ;;  %v1687_v9 = vpop.permute.xlu0 %1686  ;;  %3206 = vmatprep.subr.bf16.mxu0 %v3364_v3  ;;  %3214 = vmatprep.subr.bf16.mxu1 %v3364_v3 }
 0x13b   :  { %v1758_v14 = vsel %vm218_vm3, %v1756_v26, %v1748_v6  ;;  %v1697_v38 = vsel %vm218_vm3, %v1695_v13, %v1687_v9 }
 0x13e   :  { %v1750_v12 = vpop.permute.xlu1 %1749  ;;  %v1689_v28 = vpop.permute.xlu0 %1688 }
 0x13f   :  { %v1760_v40 = vsel %vm221_vm4, %v1758_v14, %v1750_v12  ;;  %v1699_v17 = vsel %vm221_vm4, %v1697_v38, %v1689_v28 }
 0x142   :  { %v1753_v19 = vpop.permute.xlu1 %1752  ;;  %v1692_v20 = vpop.permute.xlu0 %1691 }
 0x143   :  { %v1762_v18 = vsel %vm224_vm5, %v1760_v40, %v1753_v19  ;;  %v1701_v21 = vsel %vm224_vm5, %v1699_v17, %v1692_v20 }
 0x144   :  { %3195 = vmatmul.mubr.msk.bf16.vlgmr.msra.gmra.mrb[44].mxu0 %vm233_vm6, %v1701_v21  ;;  %3203 = vmatmul.mubr.msk.bf16.vlgmr.msra.gmra.mrb[52].mxu1 %vm233_vm6, %v1762_v18 }
 0x145   :  { %3207 = vmatpush3.bf16.msra.mxu0 %v3476_v11  ;;  %3215 = vmatpush3.bf16.msra.mxu1 %v3476_v11 }
 0x146   :  { %v1868_v59 = vpop.permute.xlu1 %1867  ;;  %v1807_v63 = vpop.permute.xlu0 %1806  ;;  %3208 = vmatprep.subr.bf16.mxu0 %v3364_v3  ;;  %3216 = vmatprep.subr.bf16.mxu1 %v3364_v3 }
 0x147   :  { %3210 = vmatprep.mubr.msk.bf16.mxu0 %vm3365_vm0, %v3364_v3  ;;  %3218 = vmatprep.mubr.msk.bf16.mxu1 %vm3365_vm0, %v3364_v3  ;;  %v1878_v4 = vsel %vm214_vm2, %v3883_v31, %v1868_v59  ;;  %v1817_v8 = vsel %vm214_vm2, %v3866_v27, %v1807_v63  ;;  %v4154_v27 = vld [vmem:[%s4581_s2] ss:$0 sm:$0xff]  ;;  %s3370_s2 = smov 6   ;;  %vm2680_vm2 = vcmask 1043456  }
 0x149   :  { %3209 = vmatpush3.bf16.msra.mxu0 %v3488_v15  ;;  %3217 = vmatpush3.bf16.msra.mxu1 %v3488_v15 }
 0x14a   :  { %v1870_v23 = vpop.permute.xlu1 %1869  ;;  %v1809_v25 = vpop.permute.xlu0 %1808  ;;  %3222 = vmatprep.subr.bf16.mxu0 %v3364_v3  ;;  %3230 = vmatprep.subr.bf16.mxu1 %v3364_v3 }
 0x14b   :  { %v1880_v33 = vsel %vm218_vm3, %v1878_v4, %v1870_v23  ;;  %v1819_v35 = vsel %vm218_vm3, %v1817_v8, %v1809_v25  ;;  %v44_v8 = vld [vmem:[%s4582_s3] sm:$0xff]  ;;  %vm2733_vm3 = vcmask 687104  }
 0x14e   :  { %v1872_v11 = vpop.permute.xlu1 %1871  ;;  %v1811_v29 = vpop.permute.xlu0 %1810 }
 0x14f   :  { %v1882_v15 = vsel %vm221_vm4, %v1880_v33, %v1872_v11  ;;  %v1821_v41 = vsel %vm221_vm4, %v1819_v35, %v1811_v29  ;;  %v45_v33 = vld [vmem:[%s4582_s3 + $0x8] sm:$0xff] }
 0x150   :  { %v4186_v35 = vpack.c.bf16 %v45_v33, %v44_v8 }
 0x151   :  { %v274_v39 = vpop.f32.mrb[0].mxu1 }
 0x152   :  { %v1875_v46 = vpop.permute.xlu1 %1874  ;;  %v1814_v53 = vpop.permute.xlu0 %1813  ;;  %v275_v45 = vadd.f32 %v4154_v27, %v274_v39 }
 0x153   :  { %v1884_v42 = vsel %vm224_vm5, %v1882_v15, %v1875_v46  ;;  %v1823_v44 = vsel %vm224_vm5, %v1821_v41, %v1814_v53  ;;  %v3004_v32 = vpop.f32.mrb[1].mxu1  ;;  %v46_v15 = vld [vmem:[%s4582_s3 + $0x10] sm:$0xff]  ;;  %v47_v41 = vld [vmem:[%s4582_s3 + $0x18] sm:$0x3f]  ;;  %s3372_s3 = smov 24  }
 0x154   :  { %v277_v31 = vpop.f32.mrb[2].mxu1  ;;  %3211 = vmatmul.mubr.msk.bf16.vlgmr.msra.gmra.mrb[48].mxu0 %vm233_vm6, %v1823_v44  ;;  %3219 = vmatmul.mubr.msk.bf16.vlgmr.msra.gmra.mrb[56].mxu1 %vm233_vm6, %v1884_v42  ;;  %v280_v22 = vmax.f32 %v275_v45, 0.0  ;;  %v49_v53 = vpack.c.bf16 %v47_v41, %v46_v15 }
 0x155   :  { %v3005_v30 = vpop.f32.mrb[3].mxu1  ;;  %3226 = vmatprep.mubr.msk.bf16.mxu0 %vm3365_vm0, %v3364_v3  ;;  %3234 = vmatprep.mubr.msk.bf16.mxu1 %vm3365_vm0, %v3364_v3 }
 0x156   :  { %3223 = vmatpush3.bf16.msra.mxu0 %v4186_v35  ;;  %3231 = vmatpush3.bf16.msra.mxu1 %v4186_v35  ;;  %v4204_v42 = vsel %vm1989_vm7, %v49_v53, 0 }
 0x157   :  { %3224 = vmatprep.subr.bf16.mxu0 %v3364_v3  ;;  %3232 = vmatprep.subr.bf16.mxu1 %v3364_v3 }
 0x159   :  { %v335_v47 = vpop.f32.mrb[4].mxu1 }
 0x15a   :  { %v336_v48 = vadd.f32 %v4154_v27, %v335_v47  ;;  %v3012_v49 = vpop.f32.mrb[5].mxu1  ;;  %3225 = vmatpush3.bf16.msra.mxu0 %v4204_v42  ;;  %3233 = vmatpush3.bf16.msra.mxu1 %v4204_v42 }
 0x15b   :  { %v338_v24 = vpop.f32.mrb[6].mxu1  ;;  %3238 = vmatprep.subr.bf16.mxu0 %v3364_v3  ;;  %3246 = vmatprep.subr.bf16.mxu1 %v3364_v3 }
 0x15c   :  { %v341_v50 = vmax.f32 %v336_v48, 0.0  ;;  %v3013_v51 = vpop.f32.mrb[7].mxu1 }
 0x15e   :  { %v4162_v52 = vmax.f32 %v280_v22, %v341_v50 }
 0x168   :  { %v396_v54 = vpop.f32.mrb[0].mxu0  ;;  %v457_v2 = vpop.f32.mrb[8].mxu1 }
 0x169   :  { %v397_v10 = vadd.f32 %v4154_v27, %v396_v54  ;;  %v458_v55 = vadd.f32 %v4154_v27, %v457_v2  ;;  %v3020_v16 = vpop.f32.mrb[1].mxu0  ;;  %v3028_v7 = vpop.f32.mrb[9].mxu1 }
 0x16a   :  { %v399_v56 = vpop.f32.mrb[2].mxu0  ;;  %v460_v57 = vpop.f32.mrb[10].mxu1 }
 0x16b   :  { %v402_v34 = vmax.f32 %v397_v10, 0.0  ;;  %v463_v36 = vmax.f32 %v458_v55, 0.0  ;;  %v3021_v58 = vpop.f32.mrb[3].mxu0  ;;  %v3029_v60 = vpop.f32.mrb[11].mxu1 }
 0x16d   :  { %v1930_v61 = vmax.f32 %v402_v34, %v463_v36 }
 0x16f   :  { %v4166_v62 = vpack.c.bf16 %v1930_v61, %v1930_v61 }
 0x171   :  { %1957 = vrot.lane.b32.xlu0 %v4166_v62, %s3370_s2 }
 0x178   :  { %v518_v0 = vpop.f32.mrb[4].mxu0  ;;  %v579_v1 = vpop.f32.mrb[12].mxu1 }
 0x179   :  { %v519_v5 = vadd.f32 %v4154_v27, %v518_v0  ;;  %v580_v37 = vadd.f32 %v4154_v27, %v579_v1  ;;  %v3036_v43 = vpop.f32.mrb[5].mxu0  ;;  %v3044_v6 = vpop.f32.mrb[13].mxu1 }
 0x17a   :  { %v521_v9 = vpop.f32.mrb[6].mxu0  ;;  %v582_v12 = vpop.f32.mrb[14].mxu1 }
 0x17b   :  { %v524_v28 = vmax.f32 %v519_v5, 0.0  ;;  %v585_v26 = vmax.f32 %v580_v37, 0.0  ;;  %v3037_v13 = vpop.f32.mrb[7].mxu0  ;;  %v3045_v14 = vpop.f32.mrb[15].mxu1 }
 0x17d   :  { %v1932_v38 = vmax.f32 %v524_v28, %v585_v26 }
 0x17f   :  { %v4172_v40 = vpack.c.bf16 %v1932_v38, %v1932_v38 }
 0x181   :  { %1960 = vrot.lane.b32.xlu0 %v4172_v40, %s3366_s25  ;;  %2034 = vrot.lane.b32.xlu1 %v4172_v40, %s3370_s2 }
 0x188   :  { %v640_v17 = vpop.f32.mrb[8].mxu0  ;;  %v701_v19 = vpop.f32.mrb[16].mxu1 }
 0x189   :  { %v641_v20 = vadd.f32 %v4154_v27, %v640_v17  ;;  %v702_v18 = vadd.f32 %v4154_v27, %v701_v19  ;;  %v3052_v21 = vpop.f32.mrb[9].mxu0  ;;  %v3060_v59 = vpop.f32.mrb[17].mxu1 }
 0x18a   :  { %v643_v63 = vpop.f32.mrb[10].mxu0  ;;  %v704_v23 = vpop.f32.mrb[18].mxu1 }
 0x18b   :  { %v646_v25 = vmax.f32 %v641_v20, 0.0  ;;  %v707_v11 = vmax.f32 %v702_v18, 0.0  ;;  %v3053_v29 = vpop.f32.mrb[11].mxu0  ;;  %v3061_v4 = vpop.f32.mrb[19].mxu1 }
 0x18d   :  { %v1934_v39 = vmax.f32 %v646_v25, %v707_v11 }
 0x18f   :  { %v4196_v46 = vpack.c.bf16 %v1934_v39, %v1934_v39 }
 0x191   :  { %1963 = vrot.lane.b32.xlu0 %v4196_v46, %s3371_s15  ;;  %2036 = vrot.lane.b32.xlu1 %v4196_v46, %s3366_s25 }
 0x195   :  { %2095 = vrot.lane.b32.xlu0 %v4196_v46, %s3370_s2 }
 0x198   :  { %v762_v44 = vpop.f32.mrb[12].mxu0  ;;  %v823_v32 = vpop.f32.mrb[20].mxu1 }
 0x199   :  { %v763_v31 = vadd.f32 %v4154_v27, %v762_v44  ;;  %v824_v30 = vadd.f32 %v4154_v27, %v823_v32  ;;  %v3068_v45 = vpop.f32.mrb[13].mxu0  ;;  %v3076_v47 = vpop.f32.mrb[21].mxu1 }
 0x19a   :  { %v765_v48 = vpop.f32.mrb[14].mxu0  ;;  %v826_v49 = vpop.f32.mrb[22].mxu1 }
 0x19b   :  { %v768_v24 = vmax.f32 %v763_v31, 0.0  ;;  %v829_v22 = vmax.f32 %v824_v30, 0.0  ;;  %v3069_v50 = vpop.f32.mrb[15].mxu0  ;;  %v3077_v51 = vpop.f32.mrb[23].mxu1 }
 0x19d   :  { %v1936_v54 = vmax.f32 %v768_v24, %v829_v22 }
 0x19f   :  { %v4214_v2 = vpack.c.bf16 %v1936_v54, %v1936_v54 }
 0x1a1   :  { %1966 = vrot.lane.b32.xlu0 %v4214_v2, %s3372_s3  ;;  %2038 = vrot.lane.b32.xlu1 %v4214_v2, %s3371_s15 }
 0x1a5   :  { %2097 = vrot.lane.b32.xlu0 %v4214_v2, %s3366_s25  ;;  %2156 = vrot.lane.b32.xlu1 %v4214_v2, %s3370_s2 }
 0x1a8   :  { %v884_v10 = vpop.f32.mrb[16].mxu0  ;;  %v945_v55 = vpop.f32.mrb[24].mxu1 }
 0x1a9   :  { %v885_v16 = vadd.f32 %v4154_v27, %v884_v10  ;;  %v946_v7 = vadd.f32 %v4154_v27, %v945_v55  ;;  %v3084_v56 = vpop.f32.mrb[17].mxu0  ;;  %v3092_v57 = vpop.f32.mrb[25].mxu1 }
 0x1aa   :  { %v887_v34 = vpop.f32.mrb[18].mxu0  ;;  %v948_v36 = vpop.f32.mrb[26].mxu1 }
 0x1ab   :  { %v890_v58 = vmax.f32 %v885_v16, 0.0  ;;  %v951_v60 = vmax.f32 %v946_v7, 0.0  ;;  %v3085_v61 = vpop.f32.mrb[19].mxu0  ;;  %v3093_v0 = vpop.f32.mrb[27].mxu1 }
 0x1ad   :  { %v1938_v1 = vmax.f32 %v890_v58, %v951_v60 }
 0x1af   :  { %v4226_v5 = vpack.c.bf16 %v1938_v1, %v1938_v1 }
 0x1b1   :  { %2099 = vrot.lane.b32.xlu0 %v4226_v5, %s3371_s15  ;;  %2041 = vrot.lane.b32.xlu1 %v4226_v5, %s3372_s3 }
 0x1b5   :  { %2217 = vrot.lane.b32.xlu0 %v4226_v5, %s3370_s2  ;;  %2158 = vrot.lane.b32.xlu1 %v4226_v5, %s3366_s25 }
 0x1b7   :  { %v1006_v37 = vpop.f32.mrb[20].mxu0  ;;  %v1067_v43 = vpop.f32.mrb[28].mxu1 }
 0x1b8   :  { %v1007_v6 = vadd.f32 %v4154_v27, %v1006_v37  ;;  %v1068_v9 = vadd.f32 %v4154_v27, %v1067_v43  ;;  %v3100_v12 = vpop.f32.mrb[21].mxu0  ;;  %v3108_v28 = vpop.f32.mrb[29].mxu1 }
 0x1b9   :  { %v1009_v26 = vpop.f32.mrb[22].mxu0  ;;  %v1070_v13 = vpop.f32.mrb[30].mxu1 }
 0x1ba   :  { %v1012_v14 = vmax.f32 %v1007_v6, 0.0  ;;  %v1073_v38 = vmax.f32 %v1068_v9, 0.0  ;;  %v3101_v17 = vpop.f32.mrb[23].mxu0  ;;  %v3109_v19 = vpop.f32.mrb[31].mxu1 }
 0x1bc   :  { %v1940_v20 = vmax.f32 %v1012_v14, %v1073_v38 }
 0x1be   :  { %v4238_v18 = vpack.c.bf16 %v1940_v20, %v1940_v20 }
 0x1c0   :  { %2102 = vrot.lane.b32.xlu0 %v4238_v18, %s3372_s3  ;;  %2160 = vrot.lane.b32.xlu1 %v4238_v18, %s3371_s15 }
 0x1c4   :  { %2219 = vrot.lane.b32.xlu0 %v4238_v18, %s3366_s25  ;;  %2278 = vrot.lane.b32.xlu1 %v4238_v18, %s3370_s2 }
 0x1c7   :  { %v1128_v21 = vpop.f32.mrb[24].mxu0  ;;  %v1189_v59 = vpop.f32.mrb[32].mxu1 }
 0x1c8   :  { %v1129_v63 = vadd.f32 %v4154_v27, %v1128_v21  ;;  %v1190_v23 = vadd.f32 %v4154_v27, %v1189_v59  ;;  %v3116_v25 = vpop.f32.mrb[25].mxu0  ;;  %v3124_v11 = vpop.f32.mrb[33].mxu1 }
 0x1c9   :  { %v1131_v29 = vpop.f32.mrb[26].mxu0  ;;  %v1192_v4 = vpop.f32.mrb[34].mxu1 }
 0x1ca   :  { %v1134_v8 = vmax.f32 %v1129_v63, 0.0  ;;  %v1195_v33 = vmax.f32 %v1190_v23, 0.0  ;;  %v3117_v39 = vpop.f32.mrb[27].mxu0  ;;  %v3125_v15 = vpop.f32.mrb[35].mxu1 }
 0x1cc   :  { %v1942_v41 = vmax.f32 %v1134_v8, %v1195_v33 }
 0x1ce   :  { %v4250_v53 = vpack.c.bf16 %v1942_v41, %v1942_v41 }
 0x1d0   :  { %2221 = vrot.lane.b32.xlu0 %v4250_v53, %s3371_s15  ;;  %2163 = vrot.lane.b32.xlu1 %v4250_v53, %s3372_s3 }
 0x1d4   :  { %2339 = vrot.lane.b32.xlu0 %v4250_v53, %s3370_s2  ;;  %2280 = vrot.lane.b32.xlu1 %v4250_v53, %s3366_s25 }
 0x1d7   :  { %v1250_v44 = vpop.f32.mrb[28].mxu0  ;;  %v1311_v32 = vpop.f32.mrb[36].mxu1 }
 0x1d8   :  { %v1251_v31 = vadd.f32 %v4154_v27, %v1250_v44  ;;  %v1312_v30 = vadd.f32 %v4154_v27, %v1311_v32  ;;  %v3132_v45 = vpop.f32.mrb[29].mxu0  ;;  %v3140_v47 = vpop.f32.mrb[37].mxu1 }
 0x1d9   :  { %v1253_v48 = vpop.f32.mrb[30].mxu0  ;;  %v1314_v49 = vpop.f32.mrb[38].mxu1 }
 0x1da   :  { %v1256_v24 = vmax.f32 %v1251_v31, 0.0  ;;  %v1317_v22 = vmax.f32 %v1312_v30, 0.0  ;;  %v3133_v50 = vpop.f32.mrb[31].mxu0  ;;  %v3141_v51 = vpop.f32.mrb[39].mxu1  ;;  %v1929_v48 = vpack.c.bf16 %v4162_v52, %v4162_v52 }
 0x1dc   :  { %v1944_v54 = vmax.f32 %v1256_v24, %v1317_v22 }
 0x1de   :  { %v4262_v10 = vpack.c.bf16 %v1944_v54, %v1944_v54 }
 0x1e0   :  { %2224 = vrot.lane.b32.xlu0 %v4262_v10, %s3372_s3  ;;  %2282 = vrot.lane.b32.xlu1 %v4262_v10, %s3371_s15 }
 0x1e3   :  { %v1958_v23 = vpop.permute.xlu0 %1957 }
 0x1e4   :  { %2341 = vrot.lane.b32.xlu0 %v4262_v10, %s3366_s25  ;;  %2400 = vrot.lane.b32.xlu1 %v4262_v10, %s3370_s2  ;;  %v1971_v50 = vsel %vm1968_vm8, %v1929_v48, %v1958_v23 }
 0x1e7   :  { %v1372_v55 = vpop.f32.mrb[32].mxu0  ;;  %v1433_v16 = vpop.f32.mrb[40].mxu1 }
 0x1e8   :  { %v1373_v7 = vadd.f32 %v4154_v27, %v1372_v55  ;;  %v1434_v56 = vadd.f32 %v4154_v27, %v1433_v16  ;;  %v3148_v57 = vpop.f32.mrb[33].mxu0  ;;  %v3156_v34 = vpop.f32.mrb[41].mxu1 }
 0x1e9   :  { %v1375_v36 = vpop.f32.mrb[34].mxu0  ;;  %v1436_v58 = vpop.f32.mrb[42].mxu1 }
 0x1ea   :  { %v1378_v60 = vmax.f32 %v1373_v7, 0.0  ;;  %v1439_v61 = vmax.f32 %v1434_v56, 0.0  ;;  %v3149_v0 = vpop.f32.mrb[35].mxu0  ;;  %v3157_v1 = vpop.f32.mrb[43].mxu1 }
 0x1ec   :  { %v1946_v37 = vmax.f32 %v1378_v60, %v1439_v61 }
 0x1ee   :  { %v4274_v43 = vpack.c.bf16 %v1946_v37, %v1946_v37 }
 0x1f0   :  { %2343 = vrot.lane.b32.xlu0 %v4274_v43, %s3371_s15  ;;  %2285 = vrot.lane.b32.xlu1 %v4274_v43, %s3372_s3 }
 0x1f3   :  { %v1961_v25 = vpop.permute.xlu0 %1960  ;;  %v2035_v49 = vpop.permute.xlu1 %2034 }
 0x1f4   :  { %2461 = vrot.lane.b32.xlu0 %v4274_v43, %s3370_s2  ;;  %2402 = vrot.lane.b32.xlu1 %v4274_v43, %s3366_s25  ;;  %v1973_v51 = vsel %vm221_vm4, %v1971_v50, %v1961_v25 }
 0x1f7   :  { %v1494_v6 = vpop.f32.mrb[36].mxu0  ;;  %v1555_v9 = vpop.f32.mrb[44].mxu1 }
 0x1f8   :  { %v1495_v12 = vadd.f32 %v4154_v27, %v1494_v6  ;;  %v1556_v28 = vadd.f32 %v4154_v27, %v1555_v9  ;;  %v3164_v26 = vpop.f32.mrb[37].mxu0  ;;  %v3172_v13 = vpop.f32.mrb[45].mxu1 }
 0x1f9   :  { %v1497_v14 = vpop.f32.mrb[38].mxu0  ;;  %v1558_v38 = vpop.f32.mrb[46].mxu1  ;;  %v2045_v13 = vsel %vm1968_vm8, %v4166_v62, %v2035_v49 }
 0x1fa   :  { %v1500_v17 = vmax.f32 %v1495_v12, 0.0  ;;  %v1561_v19 = vmax.f32 %v1556_v28, 0.0  ;;  %v3165_v20 = vpop.f32.mrb[39].mxu0  ;;  %v3173_v21 = vpop.f32.mrb[47].mxu1 }
 0x1fc   :  { %v1948_v59 = vmax.f32 %v1500_v17, %v1561_v19 }
 0x1fe   :  { %v1949_v63 = vpack.c.bf16 %v1948_v59, %v1948_v59 }
 0x200   :  { %2346 = vrot.lane.b32.xlu0 %v1949_v63, %s3372_s3  ;;  %2404 = vrot.lane.b32.xlu1 %v1949_v63, %s3371_s15 }
 0x203   :  { %v1964_v11 = vpop.permute.xlu0 %1963  ;;  %v2037_v55 = vpop.permute.xlu1 %2036 }
 0x204   :  { %2463 = vrot.lane.b32.xlu0 %v1949_v63, %s3366_s25  ;;  %2522 = vrot.lane.b32.xlu1 %v1949_v63, %s3370_s2  ;;  %v1976_v54 = vsel %vm1974_vm9, %v1973_v51, %v1964_v11  ;;  %v2047_v14 = vsel %vm221_vm4, %v2045_v13, %v2037_v55 }
 0x207   :  { %v1616_v29 = vpop.f32.mrb[40].mxu0  ;;  %v1677_v8 = vpop.f32.mrb[48].mxu1 }
 0x208   :  { %v1617_v4 = vadd.f32 %v4154_v27, %v1616_v29  ;;  %v3180_v33 = vpop.f32.mrb[41].mxu0  ;;  %v1678_v39 = vadd.f32 %v4154_v27, %v1677_v8  ;;  %v3188_v15 = vpop.f32.mrb[49].mxu1 }
 0x209   :  { %v1619_v41 = vpop.f32.mrb[42].mxu0  ;;  %v1680_v32 = vpop.f32.mrb[50].mxu1 }
 0x20a   :  { %v1622_v44 = vmax.f32 %v1617_v4, 0.0  ;;  %v3181_v31 = vpop.f32.mrb[43].mxu0  ;;  %v1683_v30 = vmax.f32 %v1678_v39, 0.0  ;;  %v3189_v45 = vpop.f32.mrb[51].mxu1 }
 0x20b   :  { %v4294_v24 = vpop.permute.xlu0 %2095 }
 0x20c   :  { %v1950_v47 = vmax.f32 %v1622_v44, %v1683_v30  ;;  %v2106_v31 = vsel %vm1968_vm8, %v4172_v40, %v4294_v24 }
 0x20e   :  { %v1951_v22 = vpack.c.bf16 %v1950_v47, %v1950_v47 }
 0x210   :  { %2465 = vrot.lane.b32.xlu0 %v1951_v22, %s3371_s15  ;;  %2407 = vrot.lane.b32.xlu1 %v1951_v22, %s3372_s3 }
 0x213   :  { %v1967_v16 = vpop.permute.xlu0 %1966  ;;  %v2039_v7 = vpop.permute.xlu1 %2038 }
 0x214   :  { %v1979_v52 = vsel %vm1977_vm10, %v1976_v54, %v1967_v16  ;;  %2524 = vrot.lane.b32.xlu1 %v1951_v22, %s3366_s25  ;;  %v2049_v38 = vsel %vm1974_vm9, %v2047_v14, %v2039_v7 }
 0x215   :  { %3227 = vmatmul.mubr.msk.bf16.vlgmr.msra.gmra.mrb[52].mxu0 %vm1986_vm11, %v1979_v52 }
 0x216   :  { %3239 = vmatpush3.bf16.msra.mxu0 %v4186_v35  ;;  %3242 = vmatprep.mubr.msk.bf16.mxu0 %vm3365_vm0, %v3364_v3 }
 0x217   :  { %3240 = vmatprep.subr.bf16.mxu0 %v3364_v3  ;;  %v1738_v56 = vpop.f32.mrb[44].mxu0  ;;  %v1799_v57 = vpop.f32.mrb[52].mxu1 }
 0x218   :  { %v1739_v34 = vadd.f32 %v4154_v27, %v1738_v56  ;;  %v1800_v36 = vadd.f32 %v4154_v27, %v1799_v57  ;;  %v3196_v58 = vpop.f32.mrb[45].mxu0  ;;  %v3204_v60 = vpop.f32.mrb[53].mxu1 }
 0x219   :  { %v1741_v61 = vpop.f32.mrb[46].mxu0  ;;  %v1802_v0 = vpop.f32.mrb[54].mxu1 }
 0x21a   :  { %3241 = vmatpush3.bf16.msra.mxu0 %v4204_v42  ;;  %v1744_v1 = vmax.f32 %v1739_v34, 0.0  ;;  %v1805_v37 = vmax.f32 %v1800_v36, 0.0  ;;  %v3197_v6 = vpop.f32.mrb[47].mxu0  ;;  %v3205_v9 = vpop.f32.mrb[55].mxu1 }
 0x21b   :  { %3254 = vmatprep.subr.bf16.mxu0 %v3364_v3  ;;  %v2157_v28 = vpop.permute.xlu1 %2156  ;;  %v2098_v17 = vpop.permute.xlu0 %2097 }
 0x21c   :  { %v1952_v12 = vmax.f32 %v1744_v1, %v1805_v37  ;;  %v2167_v24 = vsel %vm1968_vm8, %v4196_v46, %v2157_v28 }
 0x21e   :  { %v1953_v26 = vpack.c.bf16 %v1952_v12, %v1952_v12 }
 0x220   :  { %2468 = vrot.lane.b32.xlu0 %v1953_v26, %s3372_s3  ;;  %2526 = vrot.lane.b32.xlu1 %v1953_v26, %s3371_s15 }
 0x223   :  { %v2042_v19 = vpop.permute.xlu1 %2041  ;;  %v2100_v62 = vpop.permute.xlu0 %2099 }
 0x224   :  { %v2051_v20 = vsel %vm1977_vm10, %v2049_v38, %v2042_v19 }
 0x225   :  { %3235 = vmatmul.mubr.msk.bf16.vlgmr.msra.gmra.mrb[60].mxu1 %vm1986_vm11, %v2051_v20 }
 0x226   :  { %3247 = vmatpush3.bf16.msra.mxu1 %v4186_v35  ;;  %3250 = vmatprep.mubr.msk.bf16.mxu1 %vm3365_vm0, %v3364_v3 }
 0x227   :  { %3248 = vmatprep.subr.bf16.mxu1 %v3364_v3  ;;  %v1860_v21 = vpop.f32.mrb[48].mxu0  ;;  %v1921_v59 = vpop.f32.mrb[56].mxu1 }
 0x228   :  { %v1861_v63 = vadd.f32 %v4154_v27, %v1860_v21  ;;  %v1922_v23 = vadd.f32 %v4154_v27, %v1921_v59  ;;  %v3212_v25 = vpop.f32.mrb[49].mxu0  ;;  %v3220_v11 = vpop.f32.mrb[57].mxu1  ;;  %v2108_v27 = vsel %vm221_vm4, %v2106_v31, %v2098_v17 }
 0x229   :  { %v1863_v29 = vpop.f32.mrb[50].mxu0  ;;  %v1924_v4 = vpop.f32.mrb[58].mxu1  ;;  %v2110_v30 = vsel %vm1974_vm9, %v2108_v27, %v2100_v62 }
 0x22a   :  { %3249 = vmatpush3.bf16.msra.mxu1 %v4204_v42  ;;  %v1866_v8 = vmax.f32 %v1861_v63, 0.0  ;;  %v1927_v33 = vmax.f32 %v1922_v23, 0.0  ;;  %v3213_v39 = vpop.f32.mrb[51].mxu0  ;;  %v3221_v15 = vpop.f32.mrb[59].mxu1 }
 0x22b   :  { %3262 = vmatprep.subr.bf16.mxu1 %v3364_v3  ;;  %v2218_v44 = vpop.permute.xlu0 %2217  ;;  %v2159_v48 = vpop.permute.xlu1 %2158 }
 0x22c   :  { %v1954_v41 = vmax.f32 %v1866_v8, %v1927_v33  ;;  %v2169_v22 = vsel %vm221_vm4, %v2167_v24, %v2159_v48  ;;  %v2228_v52 = vsel %vm1968_vm8, %v4214_v2, %v2218_v44 }
 0x22e   :  { %v1955_v32 = vpack.c.bf16 %v1954_v41, %v1954_v41 }
 0x230   :  { %2529 = vrot.lane.b32.xlu1 %v1955_v32, %s3372_s3 }
 0x232   :  { %v2103_v45 = vpop.permute.xlu0 %2102  ;;  %v2161_v40 = vpop.permute.xlu1 %2160 }
 0x233   :  { %v2112_v47 = vsel %vm1977_vm10, %v2110_v30, %v2103_v45  ;;  %v2171_v50 = vsel %vm1974_vm9, %v2169_v22, %v2161_v40 }
 0x234   :  { %3243 = vmatmul.mubr.msk.bf16.vlgmr.msra.gmra.mrb[56].mxu0 %vm1986_vm11, %v2112_v47 }
 0x235   :  { %3255 = vmatpush3.bf16.msra.mxu0 %v4186_v35  ;;  %3258 = vmatprep.mubr.msk.bf16.mxu0 %vm3365_vm0, %v3364_v3 }
 0x236   :  { %3256 = vmatprep.subr.bf16.mxu0 %v3364_v3  ;;  %v2279_v49 = vpop.permute.xlu1 %2278  ;;  %v2220_v55 = vpop.permute.xlu0 %2219 }
 0x237   :  { %v2230_v7 = vsel %vm221_vm4, %v2228_v52, %v2220_v55  ;;  %v2289_v60 = vsel %vm1968_vm8, %v4226_v5, %v2279_v49 }
 0x239   :  { %3257 = vmatpush3.bf16.msra.mxu0 %v4204_v42 }
 0x23a   :  { %3270 = vmatprep.subr.bf16.mxu0 %v3364_v3 }
 0x242   :  { %v2164_v51 = vpop.permute.xlu1 %2163  ;;  %v2222_v16 = vpop.permute.xlu0 %2221 }
 0x243   :  { %v2173_v54 = vsel %vm1977_vm10, %v2171_v50, %v2164_v51  ;;  %v2232_v56 = vsel %vm1974_vm9, %v2230_v7, %v2222_v16 }
 0x244   :  { %3251 = vmatmul.mubr.msk.bf16.vlgmr.msra.gmra.mrb[64].mxu1 %vm1986_vm11, %v2173_v54 }
 0x245   :  { %3263 = vmatpush3.bf16.msra.mxu1 %v4186_v35  ;;  %3266 = vmatprep.mubr.msk.bf16.mxu1 %vm3365_vm0, %v3364_v3 }
 0x246   :  { %3264 = vmatprep.subr.bf16.mxu1 %v3364_v3  ;;  %v2340_v46 = vpop.permute.xlu0 %2339  ;;  %v2281_v36 = vpop.permute.xlu1 %2280 }
 0x247   :  { %v2291_v61 = vsel %vm221_vm4, %v2289_v60, %v2281_v36  ;;  %v2350_v12 = vsel %vm1968_vm8, %v4238_v18, %v2340_v46 }
 0x249   :  { %3265 = vmatpush3.bf16.msra.mxu1 %v4204_v42 }
 0x24a   :  { %3278 = vmatprep.subr.bf16.mxu1 %v3364_v3 }
 0x252   :  { %v2225_v57 = vpop.permute.xlu0 %2224  ;;  %v2283_v58 = vpop.permute.xlu1 %2282 }
 0x253   :  { %v2234_v34 = vsel %vm1977_vm10, %v2232_v56, %v2225_v57  ;;  %v2293_v0 = vsel %vm1974_vm9, %v2291_v61, %v2283_v58 }
 0x254   :  { %3259 = vmatmul.mubr.msk.bf16.vlgmr.msra.gmra.mrb[60].mxu0 %vm1986_vm11, %v2234_v34 }
 0x255   :  { %3271 = vmatpush3.bf16.msra.mxu0 %v4186_v35  ;;  %3274 = vmatprep.mubr.msk.bf16.mxu0 %vm3365_vm0, %v3364_v3 }
 0x256   :  { %3272 = vmatprep.subr.bf16.mxu0 %v3364_v3  ;;  %v2401_v2 = vpop.permute.xlu1 %2400  ;;  %v2342_v6 = vpop.permute.xlu0 %2341 }
 0x257   :  { %v2352_v28 = vsel %vm221_vm4, %v2350_v12, %v2342_v6  ;;  %v2411_v19 = vsel %vm1968_vm8, %v4250_v53, %v2401_v2 }
 0x259   :  { %3273 = vmatpush3.bf16.msra.mxu0 %v4204_v42 }
 0x25a   :  { %3286 = vmatprep.subr.bf16.mxu0 %v3364_v3 }
 0x262   :  { %v2286_v1 = vpop.permute.xlu1 %2285  ;;  %v2344_v9 = vpop.permute.xlu0 %2343 }
 0x263   :  { %v2295_v37 = vsel %vm1977_vm10, %v2293_v0, %v2286_v1  ;;  %v2354_v26 = vsel %vm1974_vm9, %v2352_v28, %v2344_v9 }
 0x264   :  { %3267 = vmatmul.mubr.msk.bf16.vlgmr.msra.gmra.mrb[68].mxu1 %vm1986_vm11, %v2295_v37 }
 0x265   :  { %3279 = vmatpush3.bf16.msra.mxu1 %v4186_v35  ;;  %3282 = vmatprep.mubr.msk.bf16.mxu1 %vm3365_vm0, %v3364_v3 }
 0x266   :  { %3280 = vmatprep.subr.bf16.mxu1 %v3364_v3  ;;  %v2462_v5 = vpop.permute.xlu0 %2461  ;;  %v2403_v38 = vpop.permute.xlu1 %2402 }
 0x267   :  { %v2413_v20 = vsel %vm221_vm4, %v2411_v19, %v2403_v38  ;;  %v2472_v23 = vsel %vm1968_vm8, %v4262_v10, %v2462_v5 }
 0x269   :  { %3281 = vmatpush3.bf16.msra.mxu1 %v4204_v42 }
 0x26a   :  { %3294 = vmatprep.subr.bf16.mxu1 %v3364_v3 }
 0x272   :  { %v2347_v13 = vpop.permute.xlu0 %2346  ;;  %v2405_v17 = vpop.permute.xlu1 %2404 }
 0x273   :  { %v2356_v14 = vsel %vm1977_vm10, %v2354_v26, %v2347_v13  ;;  %v2415_v62 = vsel %vm1974_vm9, %v2413_v20, %v2405_v17 }
 0x274   :  { %3275 = vmatmul.mubr.msk.bf16.vlgmr.msra.gmra.mrb[64].mxu0 %vm1986_vm11, %v2356_v14 }
 0x275   :  { %3287 = vmatpush3.bf16.msra.mxu0 %v4186_v35  ;;  %3290 = vmatprep.mubr.msk.bf16.mxu0 %vm3365_vm0, %v3364_v3 }
 0x276   :  { %3288 = vmatprep.subr.bf16.mxu0 %v3364_v3  ;;  %v2523_v18 = vpop.permute.xlu1 %2522  ;;  %v2464_v63 = vpop.permute.xlu0 %2463 }
 0x277   :  { %v2474_v25 = vsel %vm221_vm4, %v2472_v23, %v2464_v63  ;;  %v2533_v8 = vsel %vm1968_vm8, %v4274_v43, %v2523_v18  ;;  %v4421_v43 = vld [vmem:[%s4583_s4] ss:$0 sm:$0xff]  ;;  %s3373_s4 = smov 32  }
 0x279   :  { %3289 = vmatpush3.bf16.msra.mxu0 %v4204_v42 }
 0x27a   :  { %3302 = vmatprep.subr.bf16.mxu0 %v3364_v3 }
 0x282   :  { %v2408_v21 = vpop.permute.xlu1 %2407  ;;  %v2466_v53 = vpop.permute.xlu0 %2465 }
 0x283   :  { %v2417_v59 = vsel %vm1977_vm10, %v2415_v62, %v2408_v21  ;;  %v2476_v11 = vsel %vm1974_vm9, %v2474_v25, %v2466_v53  ;;  %v50_v62 = vld [vmem:[%s4584_s5] sm:$0xff]  ;;  %v51_v21 = vld [vmem:[%s4584_s5 + $0x8] sm:$0xff]  ;;  %v53_v53 = vld [vmem:[%s4584_s5 + $0x18] sm:$0xff] }
 0x284   :  { %3283 = vmatmul.mubr.msk.bf16.vlgmr.msra.gmra.mrb[72].mxu1 %vm1986_vm11, %v2417_v59  ;;  %v52_v59 = vld [vmem:[%s4584_s5 + $0x10] sm:$0xff]  ;;  %v60_v63 = vpack.c.bf16 %v51_v21, %v50_v62 }
 0x285   :  { %3295 = vmatpush3.bf16.msra.mxu1 %v4186_v35  ;;  %3298 = vmatprep.mubr.msk.bf16.mxu1 %vm3365_vm0, %v3364_v3 }
 0x286   :  { %3296 = vmatprep.subr.bf16.mxu1 %v3364_v3 }
 0x289   :  { %3297 = vmatpush3.bf16.msra.mxu1 %v4204_v42  ;;  %v2525_v42 = vpop.permute.xlu1 %2524 }
 0x28a   :  { %3316 = vmatprep.subr.bf16.mxu1 %v3364_v3  ;;  %v2535_v33 = vsel %vm221_vm4, %v2533_v8, %v2525_v42  ;;  %v54_v42 = vld [vmem:[%s4584_s5 + $0x20] sm:$0xff] }
 0x292   :  { %v2469_v29 = vpop.permute.xlu0 %2468  ;;  %v2527_v4 = vpop.permute.xlu1 %2526 }
 0x293   :  { %v2478_v35 = vsel %vm1977_vm10, %v2476_v11, %v2469_v29  ;;  %v2537_v10 = vsel %vm1974_vm9, %v2535_v33, %v2527_v4  ;;  %v61_v11 = vpack.c.bf16 %v53_v53, %v52_v59  ;;  %v55_v4 = vld [vmem:[%s4584_s5 + $0x28] sm:$0xff] }
 0x294   :  { %3291 = vmatmul.mubr.msk.bf16.vlgmr.msra.gmra.mrb[68].mxu0 %vm1986_vm11, %v2478_v35  ;;  %v78_v53 = vld [vmem:[%s4585_s7 + $0x68] sm:$0xff] }
 0x295   :  { %3312 = vmatprep.mubr.msk.bf16.mxu0 %vm3365_vm0, %v3364_v3  ;;  %3303 = vmatpush3.bf16.msra.mxu0 %v60_v63 }
 0x296   :  { %3304 = vmatprep.subr.bf16.mxu0 %v3364_v3 }
 0x299   :  { %3305 = vmatpush3.bf16.msra.mxu0 %v61_v11 }
 0x29a   :  { %3306 = vmatprep.subr.bf16.mxu0 %v3364_v3 }
 0x2a2   :  { %v2530_v39 = vpop.permute.xlu1 %2529 }
 0x2a3   :  { %v2539_v15 = vsel %vm1977_vm10, %v2537_v10, %v2530_v39 }
 0x2a4   :  { %3299 = vmatmul.mubr.msk.bf16.vlgmr.msra.gmra.mrb[76].mxu1 %vm1986_vm11, %v2539_v15  ;;  %v62_v15 = vpack.c.bf16 %v55_v4, %v54_v42  ;;  %v89_v42 = vld [vmem:[%s4586_s9 + $0x8] sm:$0xff]  ;;  %v90_v4 = vld [vmem:[%s4586_s9 + $0x10] sm:$0xff] }
 0x2a5   :  { %3332 = vmatprep.mubr.msk.bf16.mxu1 %vm3365_vm0, %v3364_v3 }
 0x2a6   :  { %3307 = vmatpush3.bf16.msra.mxu0 %v62_v15  ;;  %v93_v15 = vld [vmem:[%s4586_s9 + $0x28] sm:$0xff] }
 0x2a7   :  { %3308 = vmatprep.subr.bf16.mxu0 %v3364_v3 }
 0x2e8   :  { %v2027_v41 = vpop.f32.mrb[52].mxu0 }
 0x2e9   :  { %v3228_v44 = vpop.f32.mrb[53].mxu0  ;;  %v2028_v27 = vadd.f32 %v4421_v43, %v2027_v41 }
 0x2ea   :  { %v2030_v32 = vpop.f32.mrb[54].mxu0  ;;  %v56_v44 = vld [vmem:[%s4584_s5 + $0x30] sm:$0xff] }
 0x2eb   :  { %v3229_v31 = vpop.f32.mrb[55].mxu0  ;;  %v2033_v40 = vmax.f32 %v2028_v27, 0.0  ;;  %v57_v32 = vld [vmem:[%s4584_s5 + $0x38] sm:$0xff] }
 0x2ec   :  { %v63_v27 = vpack.c.bf16 %v57_v32, %v56_v44  ;;  %v94_v44 = vld [vmem:[%s4586_s9 + $0x30] sm:$0xff]  ;;  %v95_v32 = vld [vmem:[%s4586_s9 + $0x38] sm:$0xff] }
 0x2ee   :  { %3309 = vmatpush3.bf16.msra.mxu0 %v63_v27  ;;  %v2856_v27 = vld [vmem:[%s4587_s6] ss:$0 sm:$0xff] }
 0x2ef   :  { %3310 = vmatprep.subr.bf16.mxu0 %v3364_v3 }
 0x2f8   :  { %v2088_v30 = vpop.f32.mrb[60].mxu1 }
 0x2f9   :  { %v2089_v45 = vadd.f32 %v4421_v43, %v2088_v30  ;;  %v3236_v47 = vpop.f32.mrb[61].mxu1  ;;  %v58_v30 = vld [vmem:[%s4584_s5 + $0x40] sm:$0xff] }
 0x2fa   :  { %v2091_v48 = vpop.f32.mrb[62].mxu1 }
 0x2fb   :  { %v2094_v49 = vmax.f32 %v2089_v45, 0.0  ;;  %v3237_v24 = vpop.f32.mrb[63].mxu1  ;;  %v59_v45 = vld [vmem:[%s4584_s5 + $0x48] sm:$0xff] }
 0x2fc   :  { %v64_v47 = vpack.c.bf16 %v59_v45, %v58_v30 }
 0x2fd   :  { %v4425_v22 = vmax.f32 %v2033_v40, %v2094_v49 }
 0x2fe   :  { %3311 = vmatpush3.bf16.msra.mxu0 %v64_v47 }
 0x2ff   :  { %3336 = vmatprep.subr.bf16.mxu0 %v3364_v3 }
 0x307   :  { %v2149_v50 = vpop.f32.mrb[56].mxu0 }
 0x308   :  { %v3244_v51 = vpop.f32.mrb[57].mxu0  ;;  %v2150_v16 = vadd.f32 %v4421_v43, %v2149_v50  ;;  %v65_v50 = vld [vmem:[%s4585_s7] sm:$0xff] }
 0x309   :  { %v2152_v54 = vpop.f32.mrb[58].mxu0  ;;  %v66_v51 = vld [vmem:[%s4585_s7 + $0x8] sm:$0xff] }
 0x30a   :  { %v3245_v55 = vpop.f32.mrb[59].mxu0  ;;  %v2155_v57 = vmax.f32 %v2150_v16, 0.0  ;;  %v67_v54 = vld [vmem:[%s4585_s7 + $0x10] sm:$0xff]  ;;  %v80_v16 = vpack.c.bf16 %v66_v51, %v65_v50  ;;  %v96_v50 = vld [vmem:[%s4586_s9 + $0x40] sm:$0xff]  ;;  %v97_v51 = vld [vmem:[%s4586_s9 + $0x48] sm:$0xff] }
 0x30c   :  { %3317 = vmatpush3.bf16.msra.mxu1 %v80_v16 }
 0x30d   :  { %3318 = vmatprep.subr.bf16.mxu1 %v3364_v3 }
 0x317   :  { %v2210_v46 = vpop.f32.mrb[64].mxu1 }
 0x318   :  { %v2211_v52 = vadd.f32 %v4421_v43, %v2210_v46  ;;  %v3252_v7 = vpop.f32.mrb[65].mxu1  ;;  %v68_v46 = vld [vmem:[%s4585_s7 + $0x18] sm:$0xff] }
 0x319   :  { %v2213_v56 = vpop.f32.mrb[66].mxu1 }
 0x31a   :  { %v2216_v34 = vmax.f32 %v2211_v52, 0.0  ;;  %v3253_v36 = vpop.f32.mrb[67].mxu1 }
 0x31b   :  { %v69_v36 = vld [vmem:[%s4585_s7 + $0x20] sm:$0xff] }
 0x31c   :  { %v2585_v58 = vmax.f32 %v2155_v57, %v2216_v34  ;;  %v81_v57 = vpack.c.bf16 %v68_v46, %v67_v54  ;;  %v103_v54 = vpack.c.bf16 %v97_v51, %v96_v50 }
 0x31e   :  { %v2586_v2 = vpack.c.bf16 %v2585_v58, %v2585_v58  ;;  %v70_v58 = vld [vmem:[%s4585_s7 + $0x28] sm:$0xff]  ;;  %3319 = vmatpush3.bf16.msra.mxu1 %v81_v57 }
 0x31f   :  { %3320 = vmatprep.subr.bf16.mxu1 %v3364_v3 }
 0x320   :  { %2594 = vrot.lane.b32.xlu0 %v2586_v2, %s3368_s12 }
 0x327   :  { %v2271_v60 = vpop.f32.mrb[60].mxu0 }
 0x328   :  { %v3260_v61 = vpop.f32.mrb[61].mxu0  ;;  %v2272_v37 = vadd.f32 %v4421_v43, %v2271_v60 }
 0x329   :  { %v2274_v0 = vpop.f32.mrb[62].mxu0 }
 0x32a   :  { %v3261_v1 = vpop.f32.mrb[63].mxu0  ;;  %v2277_v28 = vmax.f32 %v2272_v37, 0.0  ;;  %v72_v37 = vld [vmem:[%s4585_s7 + $0x38] sm:$0xff] }
 0x32b   :  { %v71_v1 = vld [vmem:[%s4585_s7 + $0x30] sm:$0xff] }
 0x337   :  { %v2332_v6 = vpop.f32.mrb[68].mxu1 }
 0x338   :  { %v2333_v9 = vadd.f32 %v4421_v43, %v2332_v6  ;;  %v3268_v5 = vpop.f32.mrb[69].mxu1 }
 0x339   :  { %v2335_v12 = vpop.f32.mrb[70].mxu1  ;;  %v73_v5 = vld [vmem:[%s4585_s7 + $0x40] sm:$0xff] }
 0x33a   :  { %v2338_v26 = vmax.f32 %v2333_v9, 0.0  ;;  %v3269_v13 = vpop.f32.mrb[71].mxu1  ;;  %v83_v9 = vpack.c.bf16 %v72_v37, %v71_v1  ;;  %v74_v12 = vld [vmem:[%s4585_s7 + $0x48] sm:$0xff] }
 0x33b   :  { %v76_v13 = vld [vmem:[%s4585_s7 + $0x58] sm:$0xff] }
 0x33c   :  { %v2587_v14 = vmax.f32 %v2277_v28, %v2338_v26  ;;  %v84_v28 = vpack.c.bf16 %v74_v12, %v73_v5  ;;  %v75_v26 = vld [vmem:[%s4585_s7 + $0x50] sm:$0xff] }
 0x33e   :  { %v2588_v38 = vpack.c.bf16 %v2587_v14, %v2587_v14  ;;  %v85_v14 = vpack.c.bf16 %v76_v13, %v75_v26 }
 0x340   :  { %2597 = vrot.lane.b32.xlu1 %v2588_v38, %s3373_s4 }
 0x347   :  { %v2393_v17 = vpop.f32.mrb[64].mxu0 }
 0x348   :  { %v3276_v18 = vpop.f32.mrb[65].mxu0  ;;  %v2394_v23 = vadd.f32 %v4421_v43, %v2393_v17  ;;  %v2584_v17 = vpack.c.bf16 %v4425_v22, %v4425_v22  ;;  %v77_v22 = vld [vmem:[%s4585_s7 + $0x60] sm:$0xff] }
 0x349   :  { %v2396_v19 = vpop.f32.mrb[66].mxu0 }
 0x34a   :  { %v3277_v20 = vpop.f32.mrb[67].mxu0  ;;  %v2399_v33 = vmax.f32 %v2394_v23, 0.0  ;;  %v86_v23 = vpack.c.bf16 %v78_v53, %v77_v22 }
 0x357   :  { %v2454_v25 = vpop.f32.mrb[72].mxu1 }
 0x358   :  { %v2455_v29 = vadd.f32 %v4421_v43, %v2454_v25  ;;  %v3284_v35 = vpop.f32.mrb[73].mxu1  ;;  %v79_v25 = vld [vmem:[%s4585_s7 + $0x70] sm:$0xff] }
 0x359   :  { %v2457_v8 = vpop.f32.mrb[74].mxu1  ;;  %v87_v11 = vpack.c.bf16 %v79_v25, %v79_v25  ;;  %v88_v35 = vld [vmem:[%s4586_s9] sm:$0xff] }
 0x35a   :  { %v2460_v10 = vmax.f32 %v2455_v29, 0.0  ;;  %v3285_v39 = vpop.f32.mrb[75].mxu1  ;;  %v99_v8 = vpack.c.bf16 %v89_v42, %v88_v35 }
 0x35b   :  { %v2682_v29 = vsel %vm2680_vm2, %v87_v11, 0  ;;  %v92_v39 = vld [vmem:[%s4586_s9 + $0x20] sm:$0xff] }
 0x35c   :  { %v2589_v41 = vmax.f32 %v2399_v33, %v2460_v10  ;;  %v91_v33 = vld [vmem:[%s4586_s9 + $0x18] sm:$0xff] }
 0x35d   :  { %v100_v10 = vpack.c.bf16 %v91_v33, %v90_v4 }
 0x35e   :  { %v2590_v31 = vpack.c.bf16 %v2589_v41, %v2589_v41  ;;  %v101_v41 = vpack.c.bf16 %v93_v15, %v92_v39 }
 0x360   :  { %2600 = vrot.lane.b32.xlu0 %v2590_v31, %s3374_s29  ;;  %v102_v31 = vpack.c.bf16 %v95_v32, %v94_v44 }
 0x367   :  { %v2515_v48 = vpop.f32.mrb[68].mxu0 }
 0x368   :  { %v3292_v40 = vpop.f32.mrb[69].mxu0  ;;  %v2516_v55 = vadd.f32 %v4421_v43, %v2515_v48 }
 0x369   :  { %v2518_v49 = vpop.f32.mrb[70].mxu0 }
 0x36a   :  { %v3293_v24 = vpop.f32.mrb[71].mxu0  ;;  %v2521_v2 = vmax.f32 %v2516_v55, 0.0  ;;  %v98_v55 = vld [vmem:[%s4586_s9 + $0x50] sm:$0xf] }
 0x36b   :  { %v104_v16 = vpack.c.bf16 %v98_v55, %v98_v55 }
 0x36d   :  { %v2738_v46 = vsel %vm236_vm1, %v104_v16, 0 }
 0x377   :  { %v2576_v52 = vpop.f32.mrb[76].mxu1 }
 0x378   :  { %v2577_v7 = vadd.f32 %v4421_v43, %v2576_v52  ;;  %v3300_v56 = vpop.f32.mrb[77].mxu1  ;;  %v82_v43 = vpack.c.bf16 %v70_v58, %v69_v36  ;;  %v2858_v52 = vld [vmem:[%s4588_s8] ss:$0 sm:$0xff] }
 0x379   :  { %v2579_v34 = vpop.f32.mrb[78].mxu1 }
 0x37a   :  { %v2582_v60 = vmax.f32 %v2577_v7, 0.0  ;;  %v3301_v61 = vpop.f32.mrb[79].mxu1  ;;  %3321 = vmatpush3.bf16.msra.mxu1 %v82_v43 }
 0x37b   :  { %3322 = vmatprep.subr.bf16.mxu1 %v3364_v3 }
 0x37c   :  { %v2591_v0 = vmax.f32 %v2521_v2, %v2582_v60 }
 0x37e   :  { %v2592_v6 = vpack.c.bf16 %v2591_v0, %v2591_v0  ;;  %3323 = vmatpush3.bf16.msra.mxu1 %v83_v9 }
 0x37f   :  { %3324 = vmatprep.subr.bf16.mxu1 %v3364_v3 }
 0x380   :  { %2603 = vrot.lane.b32.xlu1 %v2592_v6, %s3375_s23 }
 0x382   :  { %3325 = vmatpush3.bf16.msra.mxu1 %v84_v28 }
 0x383   :  { %3326 = vmatprep.subr.bf16.mxu1 %v3364_v3 }
 0x386   :  { %3327 = vmatpush3.bf16.msra.mxu1 %v85_v14 }
 0x387   :  { %3328 = vmatprep.subr.bf16.mxu1 %v3364_v3 }
 0x38a   :  { %3329 = vmatpush3.bf16.msra.mxu1 %v86_v23 }
 0x38b   :  { %3330 = vmatprep.subr.bf16.mxu1 %v3364_v3 }
 0x38e   :  { %3331 = vmatpush3.bf16.msra.mxu1 %v2682_v29 }
 0x392   :  { %v2595_v38 = vpop.permute.xlu0 %2594 }
 0x393   :  { %v2607_v20 = vsel %vm224_vm5, %v2584_v17, %v2595_v38 }
 0x3b2   :  { %v2598_v18 = vpop.permute.xlu1 %2597 }
 0x3b3   :  { %v2610_v62 = vsel %vm2608_vm12, %v2607_v20, %v2598_v18 }
 0x3d2   :  { %v2601_v19 = vpop.permute.xlu0 %2600 }
 0x3d3   :  { %v2613_v21 = vsel %vm2611_vm13, %v2610_v62, %v2601_v19 }
 0x3f2   :  { %v2604_v59 = vpop.permute.xlu1 %2603 }
 0x3f3   :  { %v2616_v63 = vsel %vm2614_vm14, %v2613_v21, %v2604_v59 }
 0x3f4   :  { %3313 = vmatmul.mubr.msk.bf16.vlgmr.msra.gmra.mrb[72].mxu0 %vm2624_vm15, %v2616_v63 }
 0x3f5   :  { %3348 = vmatprep.mubr.msk.bf16.mxu0 %vm3365_vm0, %v3364_v3  ;;  %3337 = vmatpush3.bf16.msra.mxu0 %v99_v8  ;;  %vm2676_vm0 = vcmask 982016  }
 0x3f6   :  { %3338 = vmatprep.subr.bf16.mxu0 %v3364_v3 }
 0x3f9   :  { %3339 = vmatpush3.bf16.msra.mxu0 %v100_v10 }
 0x3fa   :  { %3340 = vmatprep.subr.bf16.mxu0 %v3364_v3 }
 0x3fd   :  { %3341 = vmatpush3.bf16.msra.mxu0 %v101_v41 }
 0x3fe   :  { %3342 = vmatprep.subr.bf16.mxu0 %v3364_v3 }
 0x401   :  { %3343 = vmatpush3.bf16.msra.mxu0 %v102_v31 }
 0x402   :  { %3344 = vmatprep.subr.bf16.mxu0 %v3364_v3 }
 0x405   :  { %3345 = vmatpush3.bf16.msra.mxu0 %v103_v54 }
 0x406   :  { %3346 = vmatprep.subr.bf16.mxu0 %v3364_v3  ;;  %v2860_v3 = vld [vmem:[%s4589_s10] ss:$0 sm:$0xff] }
 0x409   :  { %3347 = vmatpush3.bf16.msra.mxu0 %v2738_v46 }
 0x4c7   :  { %v2661_v30 = vpop.f32.mrb[72].mxu0 }
 0x4c8   :  { %v2662_v45 = vadd.f32 %v2856_v27, %v2661_v30  ;;  %v3314_v47 = vpop.f32.mrb[73].mxu0 }
 0x4c9   :  { %v2664_v48 = vpop.f32.mrb[74].mxu0 }
 0x4ca   :  { %v2667_v40 = vmax.f32 %v2662_v45, 0.0  ;;  %v3315_v49 = vpop.f32.mrb[75].mxu0 }
 0x4cc   :  { %v2668_v24 = vpack.c.bf16 %v2667_v40, %v2667_v40 }
 0x4ce   :  { %3333 = vmatmul.mubr.msk.bf16.vlgmr.msra.gmra.mrb[80].mxu1 %vm2676_vm0, %v2668_v24 }
 0x5a1   :  { %v2718_v7 = vpop.f32.mrb[80].mxu1 }
 0x5a2   :  { %v2719_v56 = vadd.f32 %v2858_v52, %v2718_v7  ;;  %v3334_v57 = vpop.f32.mrb[81].mxu1 }
 0x5a3   :  { %v2721_v34 = vpop.f32.mrb[82].mxu1 }
 0x5a4   :  { %v2724_v36 = vmax.f32 %v2719_v56, 0.0  ;;  %v3335_v58 = vpop.f32.mrb[83].mxu1 }
 0x5a6   :  { %v2725_v2 = vpack.c.bf16 %v2724_v36, %v2724_v36 }
 0x5a8   :  { %3349 = vmatmul.mubr.msk.bf16.vlgmr.msra.gmra.mrb[76].mxu0 %vm2733_vm3, %v2725_v2 }
 0x67b   :  { %v2774_v60 = vpop.f32.mrb[76].mxu0 }
 0x67c   :  { %v2775_v61 = vadd.f32 %v2860_v3, %v2774_v60  ;;  %v3350_v0 = vpop.f32.mrb[77].mxu0 }
 0x67d   :  { %v2777_v43 = vpop.f32.mrb[78].mxu0 }
 0x67e   :  { %2780 = vst [vmem:[%s4590_s11] sm:$0xff] %v2775_v61  ;;  %v3351_v1 = vpop.f32.mrb[79].mxu0 }

</bundles_post_ra>
